<compile_context>
chip_gen: v5e
topology: v5e:2x2
jax: 0.10.0
libtpu: 0.0.40
codegen_flags: <defaults>
</compile_context>

<pallas_src>
import numpy as np
import jax
import jax.numpy as jnp
from jax.experimental import pallas as pl
from jax.experimental.pallas import tpu as pltpu


def bottleneck_kernel(x_ref, w1_ref, b1_ref, w2_ref, d2s_ref, d2b_ref,
                      w3_ref, b3_ref, o_ref, pad_ref):
    B, HW, Cin = x_ref.shape
    P = w1_ref.shape[1]
    C4 = w3_ref.shape[1]
    H = pad_ref.shape[1] - 2
    W = pad_ref.shape[2]
    M = B * HW

    # conv1 (1x1, bn1 scale folded into w1) -> +bias -> relu.  bf16 MXU operands with
    # f32 accumulation; elementwise math in f32.  x is re-read later for the residual
    # instead of being kept live across all three matmuls.
    x_bf = x_ref[...].reshape(M, Cin).astype(jnp.bfloat16)
    h1 = jnp.dot(x_bf, w1_ref[...], preferred_element_type=jnp.float32)
    h1 = jnp.maximum(h1 + b1_ref[...], 0.0)

    # conv2 (3x3, stride=1, pad=1).  Scratch holds relu(conv1) with an H halo only:
    # zero just the two halo rows (cheap; interior is fully overwritten each step),
    # then write the interior -- all slices are along H, which is not a tiled dim,
    # so every access is aligned and unmasked.
    pad_ref[:, 0:1, :, :] = jnp.zeros((B, 1, W, P), jnp.bfloat16)
    pad_ref[:, H + 1:H + 2, :, :] = jnp.zeros((B, 1, W, P), jnp.bfloat16)
    pad_ref[:, 1:H + 1, :, :] = h1.astype(jnp.bfloat16).reshape(B, H, W, P)

    # 9 accumulated matmuls grouped by kernel column: the three dy taps are aligned
    # static slices along H; the dx = 0 / 2 shifts are applied afterwards to the f32
    # partial sums (the conv is linear, so shifting results == shifting inputs).
    acc_l = jnp.zeros((M, P), jnp.float32)   # kernel column dx = 0
    acc_c = jnp.zeros((M, P), jnp.float32)   # kernel column dx = 1
    acc_r = jnp.zeros((M, P), jnp.float32)   # kernel column dx = 2
    for dy in range(3):
        t = pad_ref[:, dy:dy + H, :, :].reshape(M, P)
        acc_l += jnp.dot(t, w2_ref[3 * dy + 0], preferred_element_type=jnp.float32)
        acc_c += jnp.dot(t, w2_ref[3 * dy + 1], preferred_element_type=jnp.float32)
        acc_r += jnp.dot(t, w2_ref[3 * dy + 2], preferred_element_type=jnp.float32)

    # W shifts on the flattened (B*H*W) axis via XLU roll.  The only positions the flat
    # roll gets "wrong" (wrapping across a row / batch boundary) are exactly the W-border
    # columns that the SAME-padding mask zeroes anyway.
    col = jax.lax.broadcasted_iota(jnp.int32, (M, 1), 0) % W
    acc_l = jnp.where(col == 0, 0.0, pltpu.roll(acc_l, 1, axis=0))        # out[w] <- in[w-1]
    acc_r = jnp.where(col == W - 1, 0.0, pltpu.roll(acc_r, M - 1, axis=0))  # out[w] <- in[w+1]
    acc2 = acc_c + acc_l + acc_r

    # bn2 scale folded into w2; Dropout2d folded into a per-(batch, channel) scale/bias:
    # relu(y*s2 + b2) * d == relu(y*s2*d + b2*d) because d >= 0.  d2s/d2b are resident
    # full (N, 1, P) blocks; slice this step's batch rows with program_id.
    b = pl.program_id(0)
    row0 = pl.multiple_of(b * B, B)
    ds = d2s_ref[pl.ds(row0, B), :, :]
    db = d2b_ref[pl.ds(row0, B), :, :]
    h2 = acc2.reshape(B, HW, P) * ds + db
    h2 = jnp.maximum(h2, 0.0).astype(jnp.bfloat16).reshape(M, P)

    # conv3 (1x1, bn3 scale folded) -> +bias -> residual add (downsample=None) -> relu.
    h3 = jnp.dot(h2, w3_ref[...], preferred_element_type=jnp.float32)
    res = x_ref[...].reshape(M, C4)     # re-read: still resident in the VMEM input buffer
    o_ref[...] = jnp.maximum(h3 + b3_ref[...] + res, 0.0).reshape(B, HW, C4)


def dropout_bottleneck_forward(x_nhwc, params, drop_scale, *, batch_block=None):
    """x_nhwc: (N, H, W, Cin) f32; drop_scale: (N, 1, planes) f32 (0 or 1/(1-p))."""
    (w1, s1, b1, w2, s2, b2, w3, s3, b3) = params
    N, H, W, Cin = x_nhwc.shape
    P = w1.shape[1]
    C4 = w3.shape[1]
    assert C4 == Cin, "residual add requires inplanes == planes * 4 (downsample=None)"
    if batch_block is None:
        batch_block = N          # toy shapes: collapse the grid to one step (per review)
    assert N % batch_block == 0
    B = batch_block
    HW = H * W

    # --- host-side folding (free): BN scales into weights, dropout into bn2 scale/bias.
    w1f = (w1 * s1).astype(jnp.bfloat16)                                  # (Cin, P)
    w2f = (w2 * s2.reshape(1, 1, 1, P)).reshape(9, P, P).astype(jnp.bfloat16)
    w3f = (w3 * s3).astype(jnp.bfloat16)                                  # (P, C4)
    d2s = drop_scale.astype(jnp.float32)                                  # (N, 1, P)
    d2b = (b2.reshape(1, 1, P) * drop_scale).astype(jnp.float32)          # (N, 1, P)

    x_flat = x_nhwc.reshape(N, HW, Cin)

    # Explicit scoped-VMEM budget (per review): block buffers + resident weights +
    # scratch + f32 intermediates, with headroom.  Floor at the v5e default (16 MiB).
    est = (
        2 * B * HW * Cin * 4            # x blocks (double-buffered)
        + 2 * B * HW * C4 * 4           # out blocks (double-buffered)
        + 2 * (Cin * P + 9 * P * P + P * C4) * 2   # bf16 weights
        + 2 * (P + C4) * 4              # biases
        + 2 * 2 * N * P * 4             # d2s / d2b (resident)
        + B * (H + 2) * W * P * 2       # pad scratch (bf16)
        + 6 * B * HW * P * 4            # h1 + 3 partial sums + shifted copies (f32)
        + 2 * B * HW * C4 * 4           # conv3 result + residual read (f32)
    )
    vmem_limit = int(min(max(int(est * 1.5) + (2 << 20), 16 << 20), 64 << 20))

    out_flat = pl.pallas_call(
        bottleneck_kernel,
        out_shape=jax.ShapeDtypeStruct((N, HW, C4), jnp.float32),
        grid_spec=pltpu.PrefetchScalarGridSpec(
            num_scalar_prefetch=0,
            grid=(N // B,),
            in_specs=[
                pl.BlockSpec((B, HW, Cin), lambda b: (b, 0, 0)),   # x (flattened)
                pl.BlockSpec((Cin, P), lambda b: (0, 0)),          # w1 * s1   (bf16)
                pl.BlockSpec((1, P), lambda b: (0, 0)),            # bn1 bias
                pl.BlockSpec((9, P, P), lambda b: (0, 0, 0)),      # w2 * s2   (bf16)
                pl.BlockSpec((N, 1, P), lambda b: (0, 0, 0)),      # dropout scale (resident)
                pl.BlockSpec((N, 1, P), lambda b: (0, 0, 0)),      # bn2 bias * dropout
                pl.BlockSpec((P, C4), lambda b: (0, 0)),           # w3 * s3   (bf16)
                pl.BlockSpec((1, C4), lambda b: (0, 0)),           # bn3 bias
            ],
            out_specs=pl.BlockSpec((B, HW, C4), lambda b: (b, 0, 0)),
            scratch_shapes=[pltpu.VMEM((B, H + 2, W, P), jnp.bfloat16)],
        ),
        compiler_params=pltpu.CompilerParams(
            dimension_semantics=("parallel",),
            vmem_limit_bytes=vmem_limit),
        input_output_aliases={0: 0},   # x and out: same shape/dtype, x fully read first
    )(x_flat, w1f, b1, w2f, d2s, d2b, w3f, b3)

    return out_flat.reshape(N, H, W, C4)


def reference_forward(x, w1, s1, b1, w2, s2, b2, w3, s3, b3, drop):
    """Pure-JAX f32 NHWC reference of the same forward pass (unfolded params)."""
    dn = ('NHWC', 'HWIO', 'NHWC')
    h = jax.lax.conv_general_dilated(x, w1[None, None], (1, 1), 'VALID',
                                     dimension_numbers=dn)
    h = jax.nn.relu(h * s1[0] + b1[0])
    h = jax.lax.conv_general_dilated(h, w2, (1, 1), 'SAME', dimension_numbers=dn)
    h = jax.nn.relu(h * s2[0] + b2[0])
    h = h * drop[:, :, None, :]                       # Dropout2d channel mask
    h = jax.lax.conv_general_dilated(h, w3[None, None], (1, 1), 'VALID',
                                     dimension_numbers=dn)
    h = h * s3[0] + b3[0]
    return jax.nn.relu(h + x)


def make_bn(kg, kb, km, kv, c, eps=1e-5):
    gamma = 1.0 + 0.1 * jax.random.normal(kg, (c,), jnp.float32)
    beta = 0.1 * jax.random.normal(kb, (c,), jnp.float32)
    running_mean = 0.1 * jax.random.normal(km, (c,), jnp.float32)
    running_var = jax.random.uniform(kv, (c,), jnp.float32, 0.5, 1.5)
    scale = gamma * jax.lax.rsqrt(running_var + eps)
    bias = beta - running_mean * scale
    return scale.reshape(1, c), bias.reshape(1, c)


if __name__ == "__main__":
    # Shapes consistent with the module: planes=8, inplanes=planes*4=32, batch=2,
    # spatial 8x8 (PyTorch NCHW equivalent: x of shape (2, 32, 8, 8)).
    N, H, W = 2, 8, 8
    planes = 8
    inplanes = planes * 4
    p_drop = 0.5

    keys = jax.random.split(jax.random.PRNGKey(0), 17)

    w1 = 0.2 * jax.random.normal(keys[0], (inplanes, planes), jnp.float32)
    w2 = 0.2 * jax.random.normal(keys[1], (3, 3, planes, planes), jnp.float32)
    w3 = 0.2 * jax.random.normal(keys[2], (planes, inplanes), jnp.float32)

    s1, b1 = make_bn(keys[3], keys[4], keys[5], keys[6], planes)
    s2, b2 = make_bn(keys[7], keys[8], keys[9], keys[10], planes)
    s3, b3 = make_bn(keys[11], keys[12], keys[13], keys[14], inplanes)

    # Dropout2d: per-(sample, channel) keep mask, scaled by 1/(1-p).
    keep = jax.random.bernoulli(keys[15], 1.0 - p_drop, (N, 1, planes))
    drop_scale = keep.astype(jnp.float32) / (1.0 - p_drop)

    x = jax.random.normal(keys[16], (N, H, W, inplanes), jnp.float32)

    params = (w1, s1, b1, w2, s2, b2, w3, s3, b3)
    fwd = jax.jit(dropout_bottleneck_forward, static_argnames=("batch_block",))
    out = jax.block_until_ready(fwd(x, params, drop_scale))

    ref = reference_forward(x, w1, s1, b1, w2, s2, b2, w3, s3, b3, drop_scale)
    # Loose tolerance: matmul operands are bf16 (f32 accumulation); structure bugs would
    # show up as O(1) errors, bf16 rounding is O(1e-2).
    np.testing.assert_allclose(np.asarray(out), np.asarray(ref), rtol=5e-2, atol=5e-2)
    print("KERNEL_OK")
</pallas_src>

<mosaic_0001>
module attributes {stable_mosaic.version = 11 : i64} {
  func.func @bottleneck_kernel(%arg0: i32, %arg1: memref<2x64x32xf32, #tpu.memory_space<vmem>>, %arg2: memref<32x8xbf16, #tpu.memory_space<vmem>>, %arg3: memref<1x8xf32, #tpu.memory_space<vmem>>, %arg4: memref<9x8x8xbf16, #tpu.memory_space<vmem>>, %arg5: memref<2x1x8xf32, #tpu.memory_space<vmem>>, %arg6: memref<2x1x8xf32, #tpu.memory_space<vmem>>, %arg7: memref<8x32xbf16, #tpu.memory_space<vmem>>, %arg8: memref<1x32xf32, #tpu.memory_space<vmem>>, %arg9: memref<2x64x32xf32, #tpu.memory_space<vmem>>, %arg10: memref<2x10x8x8xbf16, #tpu.memory_space<vmem>>) attributes {dimension_semantics = [#tpu.dimension_semantics<parallel>], iteration_bounds = array<i64: 1>, scalar_prefetch = 0 : i64, scratch_operands = 1 : i64, tpu.core_type = #tpu.core_type<tc>, window_params = [{transform_indices = @transform_0, window_bounds = array<i64: 2, 64, 32>}, {pipeline_mode = #tpu.pipeline_mode<synchronous>, transform_indices = @transform_1, window_bounds = array<i64: 32, 8>}, {pipeline_mode = #tpu.pipeline_mode<synchronous>, transform_indices = @transform_2, window_bounds = array<i64: 1, 8>}, {pipeline_mode = #tpu.pipeline_mode<synchronous>, transform_indices = @transform_3, window_bounds = array<i64: 9, 8, 8>}, {pipeline_mode = #tpu.pipeline_mode<synchronous>, transform_indices = @transform_4, window_bounds = array<i64: 2, 1, 8>}, {pipeline_mode = #tpu.pipeline_mode<synchronous>, transform_indices = @transform_5, window_bounds = array<i64: 2, 1, 8>}, {pipeline_mode = #tpu.pipeline_mode<synchronous>, transform_indices = @transform_6, window_bounds = array<i64: 8, 32>}, {pipeline_mode = #tpu.pipeline_mode<synchronous>, transform_indices = @transform_7, window_bounds = array<i64: 1, 32>}, {transform_indices = @transform_8, window_bounds = array<i64: 2, 64, 32>}]} {
    %c0 = arith.constant 0 : index
    %c0_0 = arith.constant 0 : index
    %c0_1 = arith.constant 0 : index
    %0 = vector.load %arg1[%c0, %c0_0, %c0_1] : memref<2x64x32xf32, #tpu.memory_space<vmem>>, vector<2x64x32xf32>
    %1 = vector.shape_cast %0 : vector<2x64x32xf32> to vector<128x32xf32>
    %2 = arith.truncf %1 : vector<128x32xf32> to vector<128x32xbf16>
    %c0_2 = arith.constant 0 : index
    %c0_3 = arith.constant 0 : index
    %3 = vector.load %arg2[%c0_2, %c0_3] : memref<32x8xbf16, #tpu.memory_space<vmem>>, vector<32x8xbf16>
    %cst = arith.constant dense<0.000000e+00> : vector<128x8xf32>
    %4 = tpu.matmul %2, %3, %cst {dimension_numbers = #tpu.dot_dimension_numbers<[1], [0], [0], [1], [0, 0, 1, 1], [], []>} : vector<128x32xbf16>, vector<32x8xbf16>, vector<128x8xf32> -> vector<128x8xf32>
    %c0_4 = arith.constant 0 : index
    %c0_5 = arith.constant 0 : index
    %5 = vector.load %arg3[%c0_4, %c0_5] : memref<1x8xf32, #tpu.memory_space<vmem>>, vector<1x8xf32>
    %6 = vector.broadcast %5 : vector<1x8xf32> to vector<128x8xf32>
    %7 = arith.addf %4, %6 : vector<128x8xf32>
    %cst_6 = arith.constant 0.000000e+00 : f32
    %8 = vector.broadcast %cst_6 : f32 to vector<128x8xf32>
    %9 = arith.maximumf %7, %8 : vector<128x8xf32>
    %cst_7 = arith.constant 0.000000e+00 : bf16
    %10 = vector.broadcast %cst_7 : bf16 to vector<2x1x8x8xbf16>
    %c0_8 = arith.constant 0 : index
    %c0_9 = arith.constant 0 : index
    %c0_10 = arith.constant 0 : index
    %c0_11 = arith.constant 0 : index
    %11 = vector.load %arg10[%c0_8, %c0_9, %c0_10, %c0_11] : memref<2x10x8x8xbf16, #tpu.memory_space<vmem>>, vector<2x1x8x8xbf16>
    tpu.vector_store %arg10[%c0_8, %c0_9, %c0_10, %c0_11], %10 {strides = array<i32>} : memref<2x10x8x8xbf16, #tpu.memory_space<vmem>>, vector<2x1x8x8xbf16>,
    %cst_12 = arith.constant 0.000000e+00 : bf16
    %12 = vector.broadcast %cst_12 : bf16 to vector<2x1x8x8xbf16>
    %c0_13 = arith.constant 0 : index
    %c9 = arith.constant 9 : index
    %c0_14 = arith.constant 0 : index
    %c0_15 = arith.constant 0 : index
    %13 = vector.load %arg10[%c0_13, %c9, %c0_14, %c0_15] : memref<2x10x8x8xbf16, #tpu.memory_space<vmem>>, vector<2x1x8x8xbf16>
    tpu.vector_store %arg10[%c0_13, %c9, %c0_14, %c0_15], %12 {strides = array<i32>} : memref<2x10x8x8xbf16, #tpu.memory_space<vmem>>, vector<2x1x8x8xbf16>,
    %14 = arith.truncf %9 : vector<128x8xf32> to vector<128x8xbf16>
    %15 = vector.shape_cast %14 : vector<128x8xbf16> to vector<2x8x8x8xbf16>
    %c0_16 = arith.constant 0 : index
    %c1 = arith.constant 1 : index
    %c0_17 = arith.constant 0 : index
    %c0_18 = arith.constant 0 : index
    %16 = vector.load %arg10[%c0_16, %c1, %c0_17, %c0_18] : memref<2x10x8x8xbf16, #tpu.memory_space<vmem>>, vector<2x8x8x8xbf16>
    tpu.vector_store %arg10[%c0_16, %c1, %c0_17, %c0_18], %15 {strides = array<i32>} : memref<2x10x8x8xbf16, #tpu.memory_space<vmem>>, vector<2x8x8x8xbf16>,
    %cst_19 = arith.constant 0.000000e+00 : f32
    %17 = vector.broadcast %cst_19 : f32 to vector<128x8xf32>
    %cst_20 = arith.constant 0.000000e+00 : f32
    %18 = vector.broadcast %cst_20 : f32 to vector<128x8xf32>
    %cst_21 = arith.constant 0.000000e+00 : f32
    %19 = vector.broadcast %cst_21 : f32 to vector<128x8xf32>
    %c0_22 = arith.constant 0 : index
    %c0_23 = arith.constant 0 : index
    %c0_24 = arith.constant 0 : index
    %c0_25 = arith.constant 0 : index
    %20 = vector.load %arg10[%c0_22, %c0_23, %c0_24, %c0_25] : memref<2x10x8x8xbf16, #tpu.memory_space<vmem>>, vector<2x8x8x8xbf16>
    %21 = vector.shape_cast %20 : vector<2x8x8x8xbf16> to vector<128x8xbf16>
    %c0_26 = arith.constant 0 : index
    %c0_27 = arith.constant 0 : index
    %c0_28 = arith.constant 0 : index
    %22 = vector.load %arg4[%c0_26, %c0_27, %c0_28] : memref<9x8x8xbf16, #tpu.memory_space<vmem>>, vector<1x8x8xbf16>
    %23 = vector.shape_cast %22 : vector<1x8x8xbf16> to vector<8x8xbf16>
    %cst_29 = arith.constant dense<0.000000e+00> : vector<128x8xf32>
    %24 = tpu.matmul %21, %23, %cst_29 {dimension_numbers = #tpu.dot_dimension_numbers<[1], [0], [0], [1], [0, 0, 1, 1], [], []>} : vector<128x8xbf16>, vector<8x8xbf16>, vector<128x8xf32> -> vector<128x8xf32>
    %25 = arith.addf %17, %24 : vector<128x8xf32>
    %c1_30 = arith.constant 1 : index
    %c0_31 = arith.constant 0 : index
    %c0_32 = arith.constant 0 : index
    %26 = vector.load %arg4[%c1_30, %c0_31, %c0_32] : memref<9x8x8xbf16, #tpu.memory_space<vmem>>, vector<1x8x8xbf16>
    %27 = vector.shape_cast %26 : vector<1x8x8xbf16> to vector<8x8xbf16>
    %cst_33 = arith.constant dense<0.000000e+00> : vector<128x8xf32>
    %28 = tpu.matmul %21, %27, %cst_33 {dimension_numbers = #tpu.dot_dimension_numbers<[1], [0], [0], [1], [0, 0, 1, 1], [], []>} : vector<128x8xbf16>, vector<8x8xbf16>, vector<128x8xf32> -> vector<128x8xf32>
    %29 = arith.addf %18, %28 : vector<128x8xf32>
    %c2 = arith.constant 2 : index
    %c0_34 = arith.constant 0 : index
    %c0_35 = arith.constant 0 : index
    %30 = vector.load %arg4[%c2, %c0_34, %c0_35] : memref<9x8x8xbf16, #tpu.memory_space<vmem>>, vector<1x8x8xbf16>
    %31 = vector.shape_cast %30 : vector<1x8x8xbf16> to vector<8x8xbf16>
    %cst_36 = arith.constant dense<0.000000e+00> : vector<128x8xf32>
    %32 = tpu.matmul %21, %31, %cst_36 {dimension_numbers = #tpu.dot_dimension_numbers<[1], [0], [0], [1], [0, 0, 1, 1], [], []>} : vector<128x8xbf16>, vector<8x8xbf16>, vector<128x8xf32> -> vector<128x8xf32>
    %33 = arith.addf %19, %32 : vector<128x8xf32>
    %c0_37 = arith.constant 0 : index
    %c1_38 = arith.constant 1 : index
    %c0_39 = arith.constant 0 : index
    %c0_40 = arith.constant 0 : index
    %34 = vector.load %arg10[%c0_37, %c1_38, %c0_39, %c0_40] : memref<2x10x8x8xbf16, #tpu.memory_space<vmem>>, vector<2x8x8x8xbf16>
    %35 = vector.shape_cast %34 : vector<2x8x8x8xbf16> to vector<128x8xbf16>
    %c3 = arith.constant 3 : index
    %c0_41 = arith.constant 0 : index
    %c0_42 = arith.constant 0 : index
    %36 = vector.load %arg4[%c3, %c0_41, %c0_42] : memref<9x8x8xbf16, #tpu.memory_space<vmem>>, vector<1x8x8xbf16>
    %37 = vector.shape_cast %36 : vector<1x8x8xbf16> to vector<8x8xbf16>
    %cst_43 = arith.constant dense<0.000000e+00> : vector<128x8xf32>
    %38 = tpu.matmul %35, %37, %cst_43 {dimension_numbers = #tpu.dot_dimension_numbers<[1], [0], [0], [1], [0, 0, 1, 1], [], []>} : vector<128x8xbf16>, vector<8x8xbf16>, vector<128x8xf32> -> vector<128x8xf32>
    %39 = arith.addf %25, %38 : vector<128x8xf32>
    %c4 = arith.constant 4 : index
    %c0_44 = arith.constant 0 : index
    %c0_45 = arith.constant 0 : index
    %40 = vector.load %arg4[%c4, %c0_44, %c0_45] : memref<9x8x8xbf16, #tpu.memory_space<vmem>>, vector<1x8x8xbf16>
    %41 = vector.shape_cast %40 : vector<1x8x8xbf16> to vector<8x8xbf16>
    %cst_46 = arith.constant dense<0.000000e+00> : vector<128x8xf32>
    %42 = tpu.matmul %35, %41, %cst_46 {dimension_numbers = #tpu.dot_dimension_numbers<[1], [0], [0], [1], [0, 0, 1, 1], [], []>} : vector<128x8xbf16>, vector<8x8xbf16>, vector<128x8xf32> -> vector<128x8xf32>
    %43 = arith.addf %29, %42 : vector<128x8xf32>
    %c5 = arith.constant 5 : index
    %c0_47 = arith.constant 0 : index
    %c0_48 = arith.constant 0 : index
    %44 = vector.load %arg4[%c5, %c0_47, %c0_48] : memref<9x8x8xbf16, #tpu.memory_space<vmem>>, vector<1x8x8xbf16>
    %45 = vector.shape_cast %44 : vector<1x8x8xbf16> to vector<8x8xbf16>
    %cst_49 = arith.constant dense<0.000000e+00> : vector<128x8xf32>
    %46 = tpu.matmul %35, %45, %cst_49 {dimension_numbers = #tpu.dot_dimension_numbers<[1], [0], [0], [1], [0, 0, 1, 1], [], []>} : vector<128x8xbf16>, vector<8x8xbf16>, vector<128x8xf32> -> vector<128x8xf32>
    %47 = arith.addf %33, %46 : vector<128x8xf32>
    %c0_50 = arith.constant 0 : index
    %c2_51 = arith.constant 2 : index
    %c0_52 = arith.constant 0 : index
    %c0_53 = arith.constant 0 : index
    %48 = vector.load %arg10[%c0_50, %c2_51, %c0_52, %c0_53] : memref<2x10x8x8xbf16, #tpu.memory_space<vmem>>, vector<2x8x8x8xbf16>
    %49 = vector.shape_cast %48 : vector<2x8x8x8xbf16> to vector<128x8xbf16>
    %c6 = arith.constant 6 : index
    %c0_54 = arith.constant 0 : index
    %c0_55 = arith.constant 0 : index
    %50 = vector.load %arg4[%c6, %c0_54, %c0_55] : memref<9x8x8xbf16, #tpu.memory_space<vmem>>, vector<1x8x8xbf16>
    %51 = vector.shape_cast %50 : vector<1x8x8xbf16> to vector<8x8xbf16>
    %cst_56 = arith.constant dense<0.000000e+00> : vector<128x8xf32>
    %52 = tpu.matmul %49, %51, %cst_56 {dimension_numbers = #tpu.dot_dimension_numbers<[1], [0], [0], [1], [0, 0, 1, 1], [], []>} : vector<128x8xbf16>, vector<8x8xbf16>, vector<128x8xf32> -> vector<128x8xf32>
    %53 = arith.addf %39, %52 : vector<128x8xf32>
    %c7 = arith.constant 7 : index
    %c0_57 = arith.constant 0 : index
    %c0_58 = arith.constant 0 : index
    %54 = vector.load %arg4[%c7, %c0_57, %c0_58] : memref<9x8x8xbf16, #tpu.memory_space<vmem>>, vector<1x8x8xbf16>
    %55 = vector.shape_cast %54 : vector<1x8x8xbf16> to vector<8x8xbf16>
    %cst_59 = arith.constant dense<0.000000e+00> : vector<128x8xf32>
    %56 = tpu.matmul %49, %55, %cst_59 {dimension_numbers = #tpu.dot_dimension_numbers<[1], [0], [0], [1], [0, 0, 1, 1], [], []>} : vector<128x8xbf16>, vector<8x8xbf16>, vector<128x8xf32> -> vector<128x8xf32>
    %57 = arith.addf %43, %56 : vector<128x8xf32>
    %c8 = arith.constant 8 : index
    %c0_60 = arith.constant 0 : index
    %c0_61 = arith.constant 0 : index
    %58 = vector.load %arg4[%c8, %c0_60, %c0_61] : memref<9x8x8xbf16, #tpu.memory_space<vmem>>, vector<1x8x8xbf16>
    %59 = vector.shape_cast %58 : vector<1x8x8xbf16> to vector<8x8xbf16>
    %cst_62 = arith.constant dense<0.000000e+00> : vector<128x8xf32>
    %60 = tpu.matmul %49, %59, %cst_62 {dimension_numbers = #tpu.dot_dimension_numbers<[1], [0], [0], [1], [0, 0, 1, 1], [], []>} : vector<128x8xbf16>, vector<8x8xbf16>, vector<128x8xf32> -> vector<128x8xf32>
    %61 = arith.addf %47, %60 : vector<128x8xf32>
    %62 = tpu.iota {dimensions = array<i32: 0>} : vector<128x1xi32>
    %c8_i32 = arith.constant 8 : i32
    %c0_i32 = arith.constant 0 : i32
    %63 = arith.cmpi eq, %c8_i32, %c0_i32 : i32
    %c1_i32 = arith.constant 1 : i32
    %64 = arith.select %63, %c1_i32, %c8_i32 : i32
    %65 = vector.broadcast %64 : i32 to vector<128x1xi32>
    %66 = arith.remsi %62, %65 : vector<128x1xi32>
    %c0_i32_63 = arith.constant 0 : i32
    %67 = vector.broadcast %c0_i32_63 : i32 to vector<128x1xi32>
    %68 = arith.cmpi ne, %66, %67 : vector<128x1xi32>
    %c0_i32_64 = arith.constant 0 : i32
    %69 = vector.broadcast %c0_i32_64 : i32 to vector<128x1xi32>
    %70 = arith.cmpi slt, %66, %69 : vector<128x1xi32>
    %c0_i32_65 = arith.constant 0 : i32
    %71 = arith.cmpi slt, %64, %c0_i32_65 : i32
    %72 = vector.broadcast %71 : i1 to vector<128x1xi1>
    %73 = vector.broadcast %72 : vector<128x1xi1> to vector<128x1xi1>
    %74 = arith.xori %70, %73 : vector<128x1xi1>
    %75 = arith.andi %74, %68 : vector<128x1xi1>
    %76 = vector.broadcast %64 : i32 to vector<128x1xi32>
    %77 = arith.addi %66, %76 : vector<128x1xi32>
    %78 = arith.select %75, %77, %66 : vector<128x1xi1>, vector<128x1xi32>
    %c0_i32_66 = arith.constant 0 : i32
    %79 = vector.broadcast %c0_i32_66 : i32 to vector<128x1xi32>
    %80 = arith.cmpi eq, %78, %79 : vector<128x1xi32>
    %c1_i32_67 = arith.constant 1 : i32
    %81 = tpu.dynamic_rotate %53 by %c1_i32_67 dim 0 : vector<128x8xf32>, i32 -> vector<128x8xf32>
    %cst_68 = arith.constant 0.000000e+00 : f32
    %82 = vector.shape_cast %80 : vector<128x1xi1> to vector<128x1xi1>
    %83 = vector.broadcast %82 : vector<128x1xi1> to vector<128x8xi1>
    %84 = vector.broadcast %cst_68 : f32 to vector<128x8xf32>
    %85 = arith.select %83, %84, %81 : vector<128x8xi1>, vector<128x8xf32>
    %c7_i32 = arith.constant 7 : i32
    %86 = vector.broadcast %c7_i32 : i32 to vector<128x1xi32>
    %87 = arith.cmpi eq, %78, %86 : vector<128x1xi32>
    %c127_i32 = arith.constant 127 : i32
    %88 = tpu.dynamic_rotate %61 by %c127_i32 dim 0 : vector<128x8xf32>, i32 -> vector<128x8xf32>
    %cst_69 = arith.constant 0.000000e+00 : f32
    %89 = vector.shape_cast %87 : vector<128x1xi1> to vector<128x1xi1>
    %90 = vector.broadcast %89 : vector<128x1xi1> to vector<128x8xi1>
    %91 = vector.broadcast %cst_69 : f32 to vector<128x8xf32>
    %92 = arith.select %90, %91, %88 : vector<128x8xi1>, vector<128x8xf32>
    %93 = arith.addf %57, %85 : vector<128x8xf32>
    %94 = arith.addf %93, %92 : vector<128x8xf32>
    %c2_i32 = arith.constant 2 : i32
    %95 = arith.muli %arg0, %c2_i32 : i32
    %96 = tpu.assume_multiple %95, 2 : i32
    %97 = arith.index_cast %96 : i32 to index
    %c0_70 = arith.constant 0 : index
    %c0_71 = arith.constant 0 : index
    %98 = vector.load %arg5[%97, %c0_70, %c0_71] : memref<2x1x8xf32, #tpu.memory_space<vmem>>, vector<2x1x8xf32>
    %99 = arith.index_cast %96 : i32 to index
    %c0_72 = arith.constant 0 : index
    %c0_73 = arith.constant 0 : index
    %100 = vector.load %arg6[%99, %c0_72, %c0_73] : memref<2x1x8xf32, #tpu.memory_space<vmem>>, vector<2x1x8xf32>
    %101 = vector.shape_cast %94 : vector<128x8xf32> to vector<2x64x8xf32>
    %102 = vector.broadcast %98 : vector<2x1x8xf32> to vector<2x64x8xf32>
    %103 = arith.mulf %101, %102 : vector<2x64x8xf32>
    %104 = vector.broadcast %100 : vector<2x1x8xf32> to vector<2x64x8xf32>
    %105 = arith.addf %103, %104 : vector<2x64x8xf32>
    %cst_74 = arith.constant 0.000000e+00 : f32
    %106 = vector.broadcast %cst_74 : f32 to vector<2x64x8xf32>
    %107 = arith.maximumf %105, %106 : vector<2x64x8xf32>
    %108 = arith.truncf %107 : vector<2x64x8xf32> to vector<2x64x8xbf16>
    %109 = vector.shape_cast %108 : vector<2x64x8xbf16> to vector<128x8xbf16>
    %c0_75 = arith.constant 0 : index
    %c0_76 = arith.constant 0 : index
    %110 = vector.load %arg7[%c0_75, %c0_76] : memref<8x32xbf16, #tpu.memory_space<vmem>>, vector<8x32xbf16>
    %cst_77 = arith.constant dense<0.000000e+00> : vector<128x32xf32>
    %111 = tpu.matmul %109, %110, %cst_77 {dimension_numbers = #tpu.dot_dimension_numbers<[1], [0], [0], [1], [0, 0, 1, 1], [], []>} : vector<128x8xbf16>, vector<8x32xbf16>, vector<128x32xf32> -> vector<128x32xf32>
    %c0_78 = arith.constant 0 : index
    %c0_79 = arith.constant 0 : index
    %c0_80 = arith.constant 0 : index
    %112 = vector.load %arg1[%c0_78, %c0_79, %c0_80] : memref<2x64x32xf32, #tpu.memory_space<vmem>>, vector<2x64x32xf32>
    %113 = vector.shape_cast %112 : vector<2x64x32xf32> to vector<128x32xf32>
    %c0_81 = arith.constant 0 : index
    %c0_82 = arith.constant 0 : index
    %114 = vector.load %arg8[%c0_81, %c0_82] : memref<1x32xf32, #tpu.memory_space<vmem>>, vector<1x32xf32>
    %115 = vector.broadcast %114 : vector<1x32xf32> to vector<128x32xf32>
    %116 = arith.addf %111, %115 : vector<128x32xf32>
    %117 = arith.addf %116, %113 : vector<128x32xf32>
    %cst_83 = arith.constant 0.000000e+00 : f32
    %118 = vector.broadcast %cst_83 : f32 to vector<128x32xf32>
    %119 = arith.maximumf %117, %118 : vector<128x32xf32>
    %120 = vector.shape_cast %119 : vector<128x32xf32> to vector<2x64x32xf32>
    %c0_84 = arith.constant 0 : index
    %c0_85 = arith.constant 0 : index
    %c0_86 = arith.constant 0 : index
    %121 = vector.load %arg9[%c0_84, %c0_85, %c0_86] : memref<2x64x32xf32, #tpu.memory_space<vmem>>, vector<2x64x32xf32>
    tpu.vector_store %arg9[%c0_84, %c0_85, %c0_86], %120 {strides = array<i32>} : memref<2x64x32xf32, #tpu.memory_space<vmem>>, vector<2x64x32xf32>,
    return
  }
  func.func @transform_0(%arg0: i32) -> (i32, i32, i32) {
    %c0_i32 = arith.constant 0 : i32
    %c0_i32_0 = arith.constant 0 : i32
    %c0_i32_1 = arith.constant 0 : i32
    return %arg0, %c0_i32, %c0_i32_0 : i32, i32, i32
  }
  func.func @transform_1(%arg0: i32) -> (i32, i32) {
    %c0_i32 = arith.constant 0 : i32
    %c0_i32_0 = arith.constant 0 : i32
    %c0_i32_1 = arith.constant 0 : i32
    return %c0_i32, %c0_i32_0 : i32, i32
  }
  func.func @transform_2(%arg0: i32) -> (i32, i32) {
    %c0_i32 = arith.constant 0 : i32
    %c0_i32_0 = arith.constant 0 : i32
    %c0_i32_1 = arith.constant 0 : i32
    return %c0_i32, %c0_i32_0 : i32, i32
  }
  func.func @transform_3(%arg0: i32) -> (i32, i32, i32) {
    %c0_i32 = arith.constant 0 : i32
    %c0_i32_0 = arith.constant 0 : i32
    %c0_i32_1 = arith.constant 0 : i32
    %c0_i32_2 = arith.constant 0 : i32
    return %c0_i32, %c0_i32_0, %c0_i32_1 : i32, i32, i32
  }
  func.func @transform_4(%arg0: i32) -> (i32, i32, i32) {
    %c0_i32 = arith.constant 0 : i32
    %c0_i32_0 = arith.constant 0 : i32
    %c0_i32_1 = arith.constant 0 : i32
    %c0_i32_2 = arith.constant 0 : i32
    return %c0_i32, %c0_i32_0, %c0_i32_1 : i32, i32, i32
  }
  func.func @transform_5(%arg0: i32) -> (i32, i32, i32) {
    %c0_i32 = arith.constant 0 : i32
    %c0_i32_0 = arith.constant 0 : i32
    %c0_i32_1 = arith.constant 0 : i32
    %c0_i32_2 = arith.constant 0 : i32
    return %c0_i32, %c0_i32_0, %c0_i32_1 : i32, i32, i32
  }
  func.func @transform_6(%arg0: i32) -> (i32, i32) {
    %c0_i32 = arith.constant 0 : i32
    %c0_i32_0 = arith.constant 0 : i32
    %c0_i32_1 = arith.constant 0 : i32
    return %c0_i32, %c0_i32_0 : i32, i32
  }
  func.func @transform_7(%arg0: i32) -> (i32, i32) {
    %c0_i32 = arith.constant 0 : i32
    %c0_i32_0 = arith.constant 0 : i32
    %c0_i32_1 = arith.constant 0 : i32
    return %c0_i32, %c0_i32_0 : i32, i32
  }
  func.func @transform_8(%arg0: i32) -> (i32, i32, i32) {
    %c0_i32 = arith.constant 0 : i32
    %c0_i32_0 = arith.constant 0 : i32
    %c0_i32_1 = arith.constant 0 : i32
    return %arg0, %c0_i32, %c0_i32_0 : i32, i32, i32
  }
}

</mosaic_0001>

<bundles_post_ra>
// kernel: dropout_bottleneck_forward.1
= control target key start
LH: loop header
LB: loop body
LE: loop exit
PB: predicated region body
PF: predicated region fallthrough
CT: control target
= control target key end

     0   :  { %vm74_vm0 = vcmask 261120   ;;  %vm307_vm1 = vcmask 1043456   ;;  %vm164_vm2 = vcmask 60416   ;;  %v1922_v25 = vmov 0   ;;  %s2801_s1 = inlined_call_operand.vmem [shape: bf16[32,8], index: 1, kind: input, shape index: {}]   ;;  %s2802_s0 = inlined_call_operand.vmem [shape: f32[2,64,32], index: 0, kind: input, shape index: {}, may-alias: {0,8}]   ;;  %s2803_s2 = inlined_call_operand.vmem [shape: f32[1,8], index: 2, kind: input, shape index: {}]   ;;  %s2804_s3 = inlined_call_operand.vmem [shape: bf16[9,8,8], index: 3, kind: input, shape index: {}]   ;;  %s2805_s6 = inlined_call_operand.vmem [shape: bf16[8,32], index: 6, kind: input, shape index: {}]   ;;  %s2806_s4 = inlined_call_operand.vmem [shape: f32[2,1,8], index: 4, kind: input, shape index: {}]   ;;  %s2807_s5 = inlined_call_operand.vmem [shape: f32[2,1,8], index: 5, kind: input, shape index: {}]   ;;  %s2808_s7 = inlined_call_operand.vmem [shape: f32[1,32], index: 7, kind: input, shape index: {}]   ;;  %s2809_s8 = inlined_call_operand.vmem [shape: f32[2,64,32], index: 8, kind: output, shape index: {}, may-alias: {0,8}]  }
   0x1   :  { %v1887_v0 = vld [vmem:[%s2801_s1 + $0x8] sm:$0xff]  ;;  %v1886_v1 = vld [vmem:[%s2801_s1] sm:$0xff]  ;;  %v32_v5 = vld [vmem:[%s2802_s0 + $0x10] sm:$0xff]  ;;  %165 = vst.msk [vmem:[#allocation2] sm:$0xf] %vm164_vm2, %v1922_v25  ;;  %vm282_vm3 = vcmask 64512  }
   0x2   :  { %105 = vmatpush.bf16.msra.mxu0 %v1887_v0  ;;  %v30_v2 = vld [vmem:[%s2802_s0] sm:$0xff]  ;;  %v31_v3 = vld [vmem:[%s2802_s0 + $0x8] sm:$0xff]  ;;  %v33_v6 = vld [vmem:[%s2802_s0 + $0x18] sm:$0xff]  ;;  %166 = vst.msk [vmem:[#allocation2 + $0x28] sm:$0xf] %vm164_vm2, %v1922_v25 }
   0x3   :  { %v46_v4 = vpack.c.bf16 %v31_v3, %v30_v2  ;;  %v47_v7 = vpack.c.bf16 %v33_v6, %v32_v5  ;;  %v34_v8 = vld [vmem:[%s2802_s0 + $0x20] sm:$0xff]  ;;  %v35_v9 = vld [vmem:[%s2802_s0 + $0x28] sm:$0xff]  ;;  %v36_v11 = vld [vmem:[%s2802_s0 + $0x30] sm:$0xff]  ;;  %168 = vst.msk [vmem:[#allocation2 + $0x24] sm:$0xf] %vm164_vm2, %v1922_v25 }
   0x4   :  { %v48_v10 = vpack.c.bf16 %v35_v9, %v34_v8  ;;  %v37_v12 = vld [vmem:[%s2802_s0 + $0x38] sm:$0xff]  ;;  %v38_v14 = vld [vmem:[%s2802_s0 + $0x40] sm:$0xff]  ;;  %v39_v15 = vld [vmem:[%s2802_s0 + $0x48] sm:$0xff]  ;;  %169 = vst.msk [vmem:[#allocation2 + $0x4c] sm:$0xf] %vm164_vm2, %v1922_v25 }
   0x5   :  { %v49_v13 = vpack.c.bf16 %v37_v12, %v36_v11  ;;  %v50_v16 = vpack.c.bf16 %v39_v15, %v38_v14  ;;  %v40_v17 = vld [vmem:[%s2802_s0 + $0x50] sm:$0xff]  ;;  %v41_v18 = vld [vmem:[%s2802_s0 + $0x58] sm:$0xff]  ;;  %v1704_v20 = vld [vmem:[%s2804_s3 + $0xc] sm:$0xf] }
   0x6   :  { %106 = vmatpush.bf16.msra.mxu0 %v1886_v1  ;;  %v51_v19 = vpack.c.bf16 %v41_v18, %v40_v17  ;;  %v309_v21 = vsel %vm307_vm1, %v1704_v20, 0  ;;  %v42_v22 = vld [vmem:[%s2802_s0 + $0x60] sm:$0xff]  ;;  %v43_v23 = vld [vmem:[%s2802_s0 + $0x68] sm:$0xff]  ;;  %v44_v26 = vld [vmem:[%s2802_s0 + $0x70] sm:$0xff] }
   0x7   :  { %1912 = vmatpush.bf16.msra.mxu1 %v309_v21  ;;  %v52_v24 = vpack.c.bf16 %v43_v23, %v42_v22  ;;  %v45_v27 = vld [vmem:[%s2802_s0 + $0x78] sm:$0xff]  ;;  %v219_v29 = vld [vmem:[%s2804_s3] sm:$0xf]  ;;  %v1785_v35 = vld [vmem:[%s2804_s3 + $0x10] sm:$0xf] }
   0x8   :  { %v53_v28 = vpack.c.bf16 %v45_v27, %v44_v26  ;;  %v425_v30 = vsel %vm307_vm1, %v219_v29, 0  ;;  %v2045_v31 = vld [vmem:[%s2803_s2] ss:$0 sm:$0xff]  ;;  %v479_v36 = vsel %vm307_vm1, %v1785_v35, 0  ;;  %v1802_v38 = vld [vmem:[%s2804_s3 + $0x14] sm:$0xf] }
   0x9   :  { %1694 = vmatmul.msk.bf16.vlgmr.msra.gmra.mxu0 %vm74_vm0, %v46_v4  ;;  %1913 = vmatpush.bf16.msra.mxu2 %v425_v30  ;;  %v585_v40 = vsel %vm307_vm1, %v1802_v38, 0  ;;  %v1702_v49 = vld [vmem:[%s2804_s3 + $0x4] sm:$0xf]  ;;  %v1819_v59 = vld [vmem:[%s2804_s3 + $0x18] sm:$0xf] }
   0xa   :  { %318 = vmatpush.bf16.msrb.mxu0 %v309_v21  ;;  %1914 = vmatpush.bf16.msra.mxu3 %v479_v36  ;;  %v531_v51 = vsel %vm307_vm1, %v1702_v49, 0  ;;  %v772_v63 = vsel %vm307_vm1, %v1819_v59, 0 }
   0xb   :  { %540 = vmatpush.bf16.msrb.mxu1 %v531_v51  ;;  %v1869_v51 = vld [vmem:[%s2804_s3 + $0x20] sm:$0xf] }
   0xd   :  { %594 = vmatpush.bf16.msrb.mxu2 %v585_v40 }
   0xe   :  { %434 = vmatpush.bf16.msra.mxu0 %v425_v30 }
  0x19   :  { %1695 = vmatmul.msk.bf16.gmra.mxu0 %vm74_vm0, %v47_v7 }
  0x29   :  { %1696 = vmatmul.msk.bf16.gmra.mxu0 %vm74_vm0, %v48_v10 }
  0x39   :  { %1697 = vmatmul.msk.bf16.gmra.mxu0 %vm74_vm0, %v49_v13 }
  0x49   :  { %1698 = vmatmul.msk.bf16.gmra.mxu0 %vm74_vm0, %v50_v16 }
  0x59   :  { %1699 = vmatmul.msk.bf16.gmra.mxu0 %vm74_vm0, %v51_v19 }
  0x69   :  { %1700 = vmatmul.msk.bf16.gmra.mxu0 %vm74_vm0, %v52_v24 }
  0x79   :  { %1701 = vmatmul.msk.bf16.gmra.mxu0 %vm74_vm0, %v53_v28 }
  0x86   :  { %v108_v32 = vpop.f32.mrf.mxu0 }
  0x87   :  { %v109_v33 = vadd.f32 %v2045_v31, %v108_v32 }
  0x89   :  { %v148_v34 = vmax.f32 %v109_v33, 0.0 }
  0x8b   :  { %v170_v37 = vpack.c.bf16 %v148_v34, %v148_v34 }
  0x8d   :  { %187 = vst.msk [vmem:[#allocation2 + $0x4] sm:$0xf] %vm164_vm2, %v170_v37 }
  0x8e   :  { %v110_v39 = vpop.f32.mrf.mxu0 }
  0x8f   :  { %v111_v41 = vadd.f32 %v2045_v31, %v110_v39 }
  0x91   :  { %v149_v42 = vmax.f32 %v111_v41, 0.0 }
  0x93   :  { %v171_v43 = vpack.c.bf16 %v149_v42, %v149_v42 }
  0x94   :  { %v2081_v62 = vld [vmem:[#allocation2] sm:$0xff] }
  0x95   :  { %188 = vst.msk [vmem:[#allocation2 + $0x8] sm:$0xf] %vm164_vm2, %v171_v43 }
  0x96   :  { %v113_v44 = vpop.f32.mrf.mxu0 }
  0x97   :  { %v114_v45 = vadd.f32 %v2045_v31, %v113_v44 }
  0x99   :  { %v150_v46 = vmax.f32 %v114_v45, 0.0 }
  0x9b   :  { %v172_v47 = vpack.c.bf16 %v150_v46, %v150_v46 }
  0x9c   :  { %v2060_v48 = vld [vmem:[#allocation2 + $0x4] sm:$0xff] }
  0x9d   :  { %189 = vst.msk [vmem:[#allocation2 + $0xc] sm:$0xf] %vm164_vm2, %v172_v47  ;;  %1737 = vmatmul.msk.bf16.vlgmr.msrb.gmra.mxu0 %vm282_vm3, %v2060_v48 }
  0x9e   :  { %v115_v50 = vpop.f32.mrf.mxu0  ;;  %488 = vmatpush.bf16.msrb.mxu0 %v479_v36 }
  0x9f   :  { %v116_v52 = vadd.f32 %v2045_v31, %v115_v50 }
  0xa1   :  { %v151_v53 = vmax.f32 %v116_v52, 0.0 }
  0xa3   :  { %v173_v54 = vpack.c.bf16 %v151_v53, %v151_v53  ;;  %v912_v53 = vsel %vm307_vm1, %v1869_v51, 0 }
  0xa4   :  { %v2070_v55 = vld [vmem:[#allocation2 + $0x8] sm:$0xff] }
  0xa5   :  { %190 = vst.msk [vmem:[#allocation2 + $0x10] sm:$0xf] %vm164_vm2, %v173_v54  ;;  %1778 = vmatmul.msk.bf16.vlgmr.msra.gmra.mxu2 %vm282_vm3, %v2070_v55  ;;  %v2116_v20 = vld [vmem:[#allocation2 + $0x8] sm:$0xff] }
  0xa6   :  { %v118_v56 = vpop.f32.mrf.mxu0  ;;  %921 = vmatpush.bf16.msra.mxu2 %v912_v53 }
  0xa7   :  { %v119_v57 = vadd.f32 %v2045_v31, %v118_v56  ;;  %v1703_v56 = vld [vmem:[%s2804_s3 + $0x8] sm:$0xf] }
  0xa9   :  { %v152_v58 = vmax.f32 %v119_v57, 0.0 }
  0xab   :  { %v174_v60 = vpack.c.bf16 %v152_v58, %v152_v58  ;;  %v637_v58 = vsel %vm307_vm1, %v1703_v56, 0 }
  0xac   :  { %v2079_v61 = vld [vmem:[#allocation2 + $0xc] sm:$0xff]  ;;  %646 = vmatpush.bf16.msrb.mxu3 %v637_v58 }
  0xad   :  { %191 = vst.msk [vmem:[#allocation2 + $0x14] sm:$0xf] %vm164_vm2, %v174_v60  ;;  %1738 = vmatmul.msk.bf16.vlgmr.msra.gmra.mxu1 %vm282_vm3, %v2079_v61  ;;  %1777 = vmatmul.msk.bf16.vlgmr.msra.gmra.mxu0 %vm282_vm3, %v2081_v62 }
  0xae   :  { %v120_v0 = vpop.f32.mrf.mxu0  ;;  %1787 = vmatmul.msk.bf16.vlgmr.msra.gmra.mxu3 %vm282_vm3, %v2079_v61  ;;  %781 = vmatpush.bf16.msra.mxu0 %v772_v63 }
  0xaf   :  { %v121_v1 = vadd.f32 %v2045_v31, %v120_v0 }
  0xb1   :  { %v153_v2 = vmax.f32 %v121_v1, 0.0 }
  0xb3   :  { %v175_v3 = vpack.c.bf16 %v153_v2, %v153_v2 }
  0xb4   :  { %v2092_v4 = vld [vmem:[#allocation2 + $0x10] sm:$0xff] }
  0xb5   :  { %192 = vst.msk [vmem:[#allocation2 + $0x18] sm:$0xf] %vm164_vm2, %v175_v3  ;;  %1779 = vmatmul.msk.bf16.gmra.mxu2 %vm282_vm3, %v2092_v4  ;;  %v2134_v32 = vld [vmem:[#allocation2 + $0x10] sm:$0xff] }
  0xb6   :  { %v123_v5 = vpop.f32.mrf.mxu0 }
  0xb7   :  { %v124_v6 = vadd.f32 %v2045_v31, %v123_v5  ;;  %v1860_v5 = vld [vmem:[%s2804_s3 + $0x1c] sm:$0xf] }
  0xb9   :  { %v154_v7 = vmax.f32 %v124_v6, 0.0  ;;  %v842_v6 = vsel %vm307_vm1, %v1860_v5, 0 }
  0xba   :  { %851 = vmatpush.bf16.msra.mxu1 %v842_v6 }
  0xbb   :  { %v176_v8 = vpack.c.bf16 %v154_v7, %v154_v7 }
  0xbc   :  { %v2098_v9 = vld [vmem:[#allocation2 + $0x14] sm:$0xff] }
  0xbd   :  { %193 = vst.msk [vmem:[#allocation2 + $0x1c] sm:$0xf] %vm164_vm2, %v176_v8  ;;  %1739 = vmatmul.msk.bf16.gmra.mxu1 %vm282_vm3, %v2098_v9  ;;  %1786 = vmatmul.msk.bf16.vlgmr.msrb.gmra.mxu0 %vm282_vm3, %v2060_v48 }
  0xbe   :  { %v125_v10 = vpop.f32.mrf.mxu0  ;;  %1788 = vmatmul.msk.bf16.gmra.mxu3 %vm282_vm3, %v2098_v9 }
  0xbf   :  { %v126_v11 = vadd.f32 %v2045_v31, %v125_v10 }
  0xc1   :  { %v155_v12 = vmax.f32 %v126_v11, 0.0 }
  0xc3   :  { %v177_v13 = vpack.c.bf16 %v155_v12, %v155_v12 }
  0xc4   :  { %v2108_v14 = vld [vmem:[#allocation2 + $0x18] sm:$0xff] }
  0xc5   :  { %194 = vst.msk [vmem:[#allocation2 + $0x20] sm:$0xf] %vm164_vm2, %v177_v13  ;;  %1780 = vmatmul.msk.bf16.gmra.mxu2 %vm282_vm3, %v2108_v14  ;;  %v2152_v43 = vld [vmem:[#allocation2 + $0x18] sm:$0xff] }
  0xc6   :  { %v128_v15 = vpop.f32.mrf.mxu0 }
  0xc7   :  { %v129_v16 = vadd.f32 %v2045_v31, %v128_v15 }
  0xc9   :  { %v156_v17 = vmax.f32 %v129_v16, 0.0 }
  0xcb   :  { %v178_v18 = vpack.c.bf16 %v156_v17, %v156_v17 }
  0xcc   :  { %v2114_v19 = vld [vmem:[#allocation2 + $0x1c] sm:$0xff] }
  0xcd   :  { %195 = vst.msk [vmem:[#allocation2 + $0x2c] sm:$0xf] %vm164_vm2, %v178_v18  ;;  %1740 = vmatmul.msk.bf16.gmra.mxu1 %vm282_vm3, %v2114_v19  ;;  %1852 = vmatmul.msk.bf16.vlgmr.msra.gmra.mxu0 %vm282_vm3, %v2116_v20  ;;  %v2178_v60 = vld [vmem:[#allocation2 + $0x20] sm:$0xff] }
  0xce   :  { %v130_v21 = vpop.f32.mrf.mxu0  ;;  %1789 = vmatmul.msk.bf16.gmra.mxu3 %vm282_vm3, %v2114_v19 }
  0xcf   :  { %v131_v22 = vadd.f32 %v2045_v31, %v130_v21 }
  0xd1   :  { %v157_v23 = vmax.f32 %v131_v22, 0.0 }
  0xd3   :  { %v179_v24 = vpack.c.bf16 %v157_v23, %v157_v23 }
  0xd4   :  { %v2126_v25 = vld [vmem:[#allocation2 + $0x28] sm:$0xff] }
  0xd5   :  { %196 = vst.msk [vmem:[#allocation2 + $0x30] sm:$0xf] %vm164_vm2, %v179_v24  ;;  %1781 = vmatmul.msk.bf16.gmra.mxu2 %vm282_vm3, %v2126_v25 }
  0xd6   :  { %v133_v26 = vpop.f32.mrf.mxu0 }
  0xd7   :  { %v134_v27 = vadd.f32 %v2045_v31, %v133_v26 }
  0xd9   :  { %v158_v28 = vmax.f32 %v134_v27, 0.0 }
  0xdb   :  { %v180_v29 = vpack.c.bf16 %v158_v28, %v158_v28 }
  0xdc   :  { %v2132_v30 = vld [vmem:[#allocation2 + $0x2c] sm:$0xff] }
  0xdd   :  { %197 = vst.msk [vmem:[#allocation2 + $0x34] sm:$0xf] %vm164_vm2, %v180_v29  ;;  %1741 = vmatmul.msk.bf16.gmra.mxu1 %vm282_vm3, %v2132_v30  ;;  %1853 = vmatmul.msk.bf16.gmra.mxu0 %vm282_vm3, %v2134_v32 }
  0xde   :  { %v135_v33 = vpop.f32.mrf.mxu0  ;;  %1790 = vmatmul.msk.bf16.gmra.mxu3 %vm282_vm3, %v2132_v30 }
  0xdf   :  { %v136_v34 = vadd.f32 %v2045_v31, %v135_v33 }
  0xe1   :  { %v159_v35 = vmax.f32 %v136_v34, 0.0 }
  0xe3   :  { %v181_v36 = vpack.c.bf16 %v159_v35, %v159_v35 }
  0xe4   :  { %v2144_v37 = vld [vmem:[#allocation2 + $0x30] sm:$0xff] }
  0xe5   :  { %198 = vst.msk [vmem:[#allocation2 + $0x38] sm:$0xf] %vm164_vm2, %v181_v36  ;;  %1782 = vmatmul.msk.bf16.gmra.mxu2 %vm282_vm3, %v2144_v37  ;;  %v2199_v7 = vld [vmem:[#allocation2 + $0x30] sm:$0xff] }
  0xe6   :  { %v138_v38 = vpop.f32.mrf.mxu0 }
  0xe7   :  { %v139_v39 = vadd.f32 %v2045_v31, %v138_v38 }
  0xe9   :  { %v160_v40 = vmax.f32 %v139_v39, 0.0 }
  0xeb   :  { %v182_v41 = vpack.c.bf16 %v160_v40, %v160_v40 }
  0xec   :  { %v2150_v42 = vld [vmem:[#allocation2 + $0x34] sm:$0xff] }
  0xed   :  { %199 = vst.msk [vmem:[#allocation2 + $0x3c] sm:$0xf] %vm164_vm2, %v182_v41  ;;  %1742 = vmatmul.msk.bf16.gmra.mxu1 %vm282_vm3, %v2150_v42  ;;  %1854 = vmatmul.msk.bf16.gmra.mxu0 %vm282_vm3, %v2152_v43 }
  0xee   :  { %v140_v44 = vpop.f32.mrf.mxu0  ;;  %1791 = vmatmul.msk.bf16.gmra.mxu3 %vm282_vm3, %v2150_v42 }
  0xef   :  { %v141_v45 = vadd.f32 %v2045_v31, %v140_v44 }
  0xf1   :  { %v161_v46 = vmax.f32 %v141_v45, 0.0 }
  0xf3   :  { %v183_v47 = vpack.c.bf16 %v161_v46, %v161_v46 }
  0xf4   :  { %v2162_v49 = vld [vmem:[#allocation2 + $0x38] sm:$0xff] }
  0xf5   :  { %200 = vst.msk [vmem:[#allocation2 + $0x40] sm:$0xf] %vm164_vm2, %v183_v47  ;;  %1783 = vmatmul.msk.bf16.gmra.mxu2 %vm282_vm3, %v2162_v49  ;;  %v2209_v10 = vld [vmem:[#allocation2 + $0x38] sm:$0xff] }
  0xf6   :  { %v143_v50 = vpop.f32.mrf.mxu0 }
  0xf7   :  { %v144_v52 = vadd.f32 %v2045_v31, %v143_v50 }
  0xf9   :  { %v162_v54 = vmax.f32 %v144_v52, 0.0 }
  0xfb   :  { %v184_v57 = vpack.c.bf16 %v162_v54, %v162_v54 }
  0xfc   :  { %v2176_v59 = vld [vmem:[#allocation2 + $0x3c] sm:$0xff] }
  0xfd   :  { %201 = vst.msk [vmem:[#allocation2 + $0x44] sm:$0xf] %vm164_vm2, %v184_v57  ;;  %1743 = vmatmul.msk.bf16.gmra.mxu1 %vm282_vm3, %v2176_v59  ;;  %1855 = vmatmul.msk.bf16.gmra.mxu0 %vm282_vm3, %v2178_v60 }
  0xfe   :  { %v145_v63 = vpop.f32.mrf.mxu0  ;;  %1792 = vmatmul.msk.bf16.gmra.mxu3 %vm282_vm3, %v2176_v59 }
  0xff   :  { %v146_v0 = vadd.f32 %v2045_v31, %v145_v63 }
 0x101   :  { %v163_v1 = vmax.f32 %v146_v0, 0.0 }
 0x103   :  { %v185_v2 = vpack.c.bf16 %v163_v1, %v163_v1 }
 0x104   :  { %v2188_v3 = vld [vmem:[#allocation2 + $0x40] sm:$0xff] }
 0x105   :  { %202 = vst.msk [vmem:[#allocation2 + $0x48] sm:$0xf] %vm164_vm2, %v185_v2  ;;  %1784 = vmatmul.msk.bf16.gmra.mxu2 %vm282_vm3, %v2188_v3  ;;  %v2219_v17 = vld [vmem:[#allocation2 + $0x40] sm:$0xff] }
 0x10c   :  { %v2197_v31 = vld [vmem:[#allocation2 + $0x44] sm:$0xff] }
 0x10d   :  { %1744 = vmatmul.msk.bf16.gmra.mxu1 %vm282_vm3, %v2197_v31  ;;  %1856 = vmatmul.msk.bf16.gmra.mxu0 %vm282_vm3, %v2199_v7  ;;  %v2231_v28 = vld [vmem:[#allocation2 + $0x48] sm:$0xff] }
 0x10e   :  { %1793 = vmatmul.msk.bf16.gmra.mxu3 %vm282_vm3, %v2197_v31 }
 0x115   :  { %1803 = vmatmul.msk.bf16.vlgmr.msrb.gmra.mxu2 %vm282_vm3, %v2060_v48 }
 0x11a   :  { %v320_v8 = vpop.f32.mrf.mxu0 }
 0x11d   :  { %1794 = vmatmul.msk.bf16.vlgmr.msrb.gmra.mxu1 %vm282_vm3, %v2081_v62  ;;  %1857 = vmatmul.msk.bf16.gmra.mxu0 %vm282_vm3, %v2209_v10 }
 0x11e   :  { %1811 = vmatmul.msk.bf16.vlgmr.msrb.gmra.mxu3 %vm282_vm3, %v2081_v62 }
 0x122   :  { %v322_v11 = vpop.f32.mrf.mxu0 }
 0x125   :  { %1804 = vmatmul.msk.bf16.gmra.mxu2 %vm282_vm3, %v2079_v61 }
 0x128   :  { %v441_v12 = vpop.f32.mrf.mxu2 }
 0x12a   :  { %v325_v13 = vpop.f32.mrf.mxu1  ;;  %v436_v15 = vpop.f32.mrf.mxu0 }
 0x12b   :  { %v442_v48 = vadd.f32 %v441_v12, %v325_v13  ;;  %v437_v16 = vadd.f32 %v436_v15, %v320_v8 }
 0x12d   :  { %1795 = vmatmul.msk.bf16.gmra.mxu1 %vm282_vm3, %v2070_v55  ;;  %1858 = vmatmul.msk.bf16.gmra.mxu0 %vm282_vm3, %v2219_v17 }
 0x12e   :  { %1812 = vmatmul.msk.bf16.gmra.mxu3 %vm282_vm3, %v2070_v55 }
 0x130   :  { %v443_v62 = vpop.f32.mrf.mxu2 }
 0x131   :  { %v2261_v54 = vpop.f32.mrf.mxu3 }
 0x132   :  { %v327_v18 = vpop.f32.mrf.mxu1  ;;  %v438_v21 = vpop.f32.mrf.mxu0 }
 0x133   :  { %v444_v61 = vadd.f32 %v443_v62, %v327_v18  ;;  %v439_v22 = vadd.f32 %v438_v21, %v322_v11 }
 0x135   :  { %1805 = vmatmul.msk.bf16.gmra.mxu2 %vm282_vm3, %v2098_v9 }
 0x138   :  { %v446_v23 = vpop.f32.mrf.mxu2 }
 0x139   :  { %v2271_v6 = vpop.f32.mrf.mxu3 }
 0x13a   :  { %v330_v24 = vpop.f32.mrf.mxu1  ;;  %v2229_v26 = vpop.f32.mrf.mxu0 }
 0x13b   :  { %v447_v27 = vadd.f32 %v446_v23, %v330_v24 }
 0x13d   :  { %1796 = vmatmul.msk.bf16.gmra.mxu1 %vm282_vm3, %v2092_v4  ;;  %1859 = vmatmul.msk.bf16.gmra.mxu0 %vm282_vm3, %v2231_v28 }
 0x13e   :  { %1813 = vmatmul.msk.bf16.gmra.mxu3 %vm282_vm3, %v2092_v4  ;;  %v979_v4 = vlaneseq }
 0x140   :  { %v448_v55 = vpop.f32.mrf.mxu2  ;;  %v2249_v45 = vshrl.u32 %v979_v4, 7 }
 0x141   :  { %v2283_v62 = vpop.f32.mrf.mxu3 }
 0x142   :  { %v332_v29 = vpop.f32.mrf.mxu1  ;;  %v2239_v33 = vpop.f32.mrf.mxu0  ;;  %vm1220_vm4 = vcmp.lt.s32.totalorder %v2249_v45, 1  ;;  %vm1317_vm7 = vcmp.lt.s32.totalorder %v2249_v45, 7 }
 0x143   :  { %v449_v9 = vadd.f32 %v448_v55, %v332_v29 }
 0x145   :  { %1806 = vmatmul.msk.bf16.gmra.mxu2 %vm282_vm3, %v2114_v19 }
 0x148   :  { %v451_v34 = vpop.f32.mrf.mxu2 }
 0x149   :  { %v2295_v55 = vpop.f32.mrf.mxu3 }
 0x14a   :  { %v335_v35 = vpop.f32.mrf.mxu1  ;;  %v783_v36 = vpop.f32.mrf.mxu0 }
 0x14b   :  { %v452_v38 = vadd.f32 %v451_v34, %v335_v35  ;;  %v2243_v39 = vadd.f32 %v783_v36, %v437_v16 }
 0x14d   :  { %1797 = vmatmul.msk.bf16.gmra.mxu1 %vm282_vm3, %v2108_v14  ;;  %v1204_v47 = vrot.slane %v2243_v39, 7 }
 0x14e   :  { %1814 = vmatmul.msk.bf16.gmra.mxu3 %vm282_vm3, %v2108_v14 }
 0x150   :  { %v453_v40 = vpop.f32.mrf.mxu2 }
 0x152   :  { %v337_v41 = vpop.f32.mrf.mxu1  ;;  %v785_v44 = vpop.f32.mrf.mxu0 }
 0x153   :  { %v454_v46 = vadd.f32 %v453_v40, %v337_v41  ;;  %v824_v19 = vadd.f32 %v785_v44, %v439_v22 }
 0x155   :  { %v1205_v50 = vrot.slane %v824_v19, 7  ;;  %1807 = vmatmul.msk.bf16.gmra.mxu2 %vm282_vm3, %v2132_v30 }
 0x157   :  { %v2259_v14 = vsel %vm1220_vm4, %v1204_v47, %v1205_v50 }
 0x158   :  { %v456_v51 = vpop.f32.mrf.mxu2 }
 0x15a   :  { %v340_v52 = vpop.f32.mrf.mxu1  ;;  %v788_v53 = vpop.f32.mrf.mxu0 }
 0x15b   :  { %v457_v56 = vadd.f32 %v456_v51, %v340_v52  ;;  %v825_v57 = vadd.f32 %v788_v53, %v442_v48 }
 0x15d   :  { %v1206_v58 = vrot.slane %v825_v57, 7  ;;  %1798 = vmatmul.msk.bf16.gmra.mxu1 %vm282_vm3, %v2126_v25 }
 0x15e   :  { %1815 = vmatmul.msk.bf16.gmra.mxu3 %vm282_vm3, %v2126_v25 }
 0x15f   :  { %v2269_v30 = vsel %vm1220_vm4, %v1205_v50, %v1206_v58  ;;  %v2305_v50 = vpop.f32.mrf.mxu3 }
 0x160   :  { %v458_v63 = vpop.f32.mrf.mxu2 }
 0x162   :  { %v342_v0 = vpop.f32.mrf.mxu1  ;;  %v790_v1 = vpop.f32.mrf.mxu0 }
 0x163   :  { %v459_v2 = vadd.f32 %v458_v63, %v342_v0  ;;  %v826_v5 = vadd.f32 %v790_v1, %v444_v61 }
 0x165   :  { %v1207_v8 = vrot.slane %v826_v5, 7  ;;  %1808 = vmatmul.msk.bf16.gmra.mxu2 %vm282_vm3, %v2150_v42 }
 0x167   :  { %v2277_v11 = vsel %vm1220_vm4, %v1206_v58, %v1207_v8 }
 0x168   :  { %v461_v25 = vpop.f32.mrf.mxu2 }
 0x16a   :  { %v345_v12 = vpop.f32.mrf.mxu1  ;;  %v793_v13 = vpop.f32.mrf.mxu0 }
 0x16b   :  { %v462_v15 = vadd.f32 %v461_v25, %v345_v12  ;;  %v827_v48 = vadd.f32 %v793_v13, %v447_v27 }
 0x16d   :  { %v1208_v16 = vrot.slane %v827_v48, 7  ;;  %1799 = vmatmul.msk.bf16.gmra.mxu1 %vm282_vm3, %v2144_v37 }
 0x16e   :  { %1816 = vmatmul.msk.bf16.gmra.mxu3 %vm282_vm3, %v2144_v37 }
 0x16f   :  { %v2287_v42 = vsel %vm1220_vm4, %v1207_v8, %v1208_v16 }
 0x170   :  { %v463_v18 = vpop.f32.mrf.mxu2 }
 0x172   :  { %v347_v21 = vpop.f32.mrf.mxu1  ;;  %v795_v61 = vpop.f32.mrf.mxu0 }
 0x173   :  { %v464_v22 = vadd.f32 %v463_v18, %v347_v21  ;;  %v828_v23 = vadd.f32 %v795_v61, %v449_v9 }
 0x175   :  { %v1209_v24 = vrot.slane %v828_v23, 7  ;;  %1809 = vmatmul.msk.bf16.gmra.mxu2 %vm282_vm3, %v2176_v59 }
 0x177   :  { %v2293_v27 = vsel %vm1220_vm4, %v1208_v16, %v1209_v24 }
 0x178   :  { %v466_v37 = vpop.f32.mrf.mxu2 }
 0x17a   :  { %v350_v29 = vpop.f32.mrf.mxu1  ;;  %v798_v34 = vpop.f32.mrf.mxu0 }
 0x17b   :  { %v467_v35 = vadd.f32 %v466_v37, %v350_v29  ;;  %v829_v36 = vadd.f32 %v798_v34, %v452_v38 }
 0x17d   :  { %v1210_v4 = vrot.slane %v829_v36, 7  ;;  %1800 = vmatmul.msk.bf16.gmra.mxu1 %vm282_vm3, %v2162_v49 }
 0x17e   :  { %1817 = vmatmul.msk.bf16.gmra.mxu3 %vm282_vm3, %v2162_v49 }
 0x17f   :  { %v2303_v59 = vsel %vm1220_vm4, %v1209_v24, %v1210_v4 }
 0x180   :  { %v468_v9 = vpop.f32.mrf.mxu2 }
 0x182   :  { %v352_v40 = vpop.f32.mrf.mxu1  ;;  %v800_v41 = vpop.f32.mrf.mxu0 }
 0x183   :  { %v469_v44 = vadd.f32 %v468_v9, %v352_v40  ;;  %v830_v19 = vadd.f32 %v800_v41, %v454_v46  ;;  %v2315_v46 = vpop.f32.mrf.mxu3 }
 0x185   :  { %v1211_v51 = vrot.slane %v830_v19, 7  ;;  %1810 = vmatmul.msk.bf16.gmra.mxu2 %vm282_vm3, %v2197_v31 }
 0x187   :  { %v2311_v38 = vsel %vm1220_vm4, %v1210_v4, %v1211_v51 }
 0x188   :  { %v471_v49 = vpop.f32.mrf.mxu2 }
 0x18a   :  { %v355_v52 = vpop.f32.mrf.mxu1  ;;  %v803_v53 = vpop.f32.mrf.mxu0 }
 0x18b   :  { %v472_v57 = vadd.f32 %v471_v49, %v355_v52  ;;  %v831_v58 = vadd.f32 %v803_v53, %v457_v56  ;;  %v2347_v29 = vpop.f32.mrf.mxu3 }
 0x18d   :  { %v1212_v63 = vrot.slane %v831_v58, 7  ;;  %1801 = vmatmul.msk.bf16.gmra.mxu1 %vm282_vm3, %v2188_v3 }
 0x18e   :  { %1818 = vmatmul.msk.bf16.gmra.mxu3 %vm282_vm3, %v2188_v3 }
 0x18f   :  { %v2321_v31 = vsel %vm1220_vm4, %v1211_v51, %v1212_v63 }
 0x190   :  { %v473_v0 = vpop.f32.mrf.mxu2 }
 0x192   :  { %v357_v1 = vpop.f32.mrf.mxu1  ;;  %v805_v5 = vpop.f32.mrf.mxu0 }
 0x193   :  { %v474_v8 = vadd.f32 %v473_v0, %v357_v1  ;;  %v832_v25 = vadd.f32 %v805_v5, %v459_v2  ;;  %v1497_v2 = vld [vmem:[%s2805_s6] sm:$0xf] }
 0x194   :  { %v1583_v21 = vsel %vm307_vm1, %v1497_v2, 0 }
 0x195   :  { %v1213_v12 = vrot.slane %v832_v25, 7  ;;  %1870 = vmatmul.msk.bf16.vlgmr.msra.gmra.mxu2 %vm282_vm3, %v2116_v20  ;;  %1592 = vmatpush.bf16.msra.mxu3 %v1583_v21 }
 0x197   :  { %v2327_v56 = vsel %vm1220_vm4, %v1212_v63, %v1213_v12 }
 0x198   :  { %v2329_v13 = vpop.f32.mrf.mxu2 }
 0x19a   :  { %v2331_v3 = vpop.f32.mrf.mxu1  ;;  %v808_v48 = vpop.f32.mrf.mxu0 }
 0x19b   :  { %v833_v16 = vadd.f32 %v808_v48, %v462_v15 }
 0x19d   :  { %v1214_v18 = vrot.slane %v833_v16, 7  ;;  %1861 = vmatmul.msk.bf16.vlgmr.msra.gmra.mxu1 %vm282_vm3, %v2116_v20 }
 0x19f   :  { %v2341_v61 = vsel %vm1220_vm4, %v1213_v12, %v1214_v18 }
 0x1a0   :  { %v2343_v23 = vpop.f32.mrf.mxu2 }
 0x1a2   :  { %v2345_v24 = vpop.f32.mrf.mxu1  ;;  %v810_v15 = vpop.f32.mrf.mxu0 }
 0x1a3   :  { %v834_v37 = vadd.f32 %v810_v15, %v464_v22  ;;  %v2361_v22 = vpop.f32.mrf.mxu3 }
 0x1a5   :  { %v1215_v20 = vrot.slane %v834_v37, 7  ;;  %1871 = vmatmul.msk.bf16.gmra.mxu2 %vm282_vm3, %v2134_v32 }
 0x1a7   :  { %v2353_v34 = vsel %vm1220_vm4, %v1214_v18, %v1215_v20 }
 0x1a8   :  { %2810 = vst [vmem:[#allocation3_spill] sm:$0xff] %v2353_v34  ;;  %v2355_v36 = vpop.f32.mrf.mxu2 }
 0x1aa   :  { %v2357_v4 = vpop.f32.mrf.mxu1  ;;  %v813_v9 = vpop.f32.mrf.mxu0 }
 0x1ab   :  { %v835_v40 = vadd.f32 %v813_v9, %v467_v35  ;;  %v2379_v63 = vpop.f32.mrf.mxu3 }
 0x1ad   :  { %v1216_v41 = vrot.slane %v835_v40, 7  ;;  %1862 = vmatmul.msk.bf16.gmra.mxu1 %vm282_vm3, %v2134_v32 }
 0x1af   :  { %v2365_v19 = vsel %vm1220_vm4, %v1215_v20, %v1216_v41 }
 0x1b0   :  { %2811 = vst [vmem:[#allocation4_spill] sm:$0xff] %v2365_v19  ;;  %v2367_v51 = vpop.f32.mrf.mxu2 }
 0x1b2   :  { %v2369_v49 = vpop.f32.mrf.mxu1  ;;  %v815_v52 = vpop.f32.mrf.mxu0 }
 0x1b3   :  { %v836_v53 = vadd.f32 %v815_v52, %v469_v44  ;;  %v2393_v2 = vpop.f32.mrf.mxu3 }
 0x1b4   :  { %2814 = vst [vmem:[#allocation7_spill] sm:$0xff] %v2393_v2 }
 0x1b5   :  { %v1217_v58 = vrot.slane %v836_v53, 7  ;;  %1872 = vmatmul.msk.bf16.gmra.mxu2 %vm282_vm3, %v2152_v43 }
 0x1b7   :  { %v2375_v35 = vsel %vm1220_vm4, %v1216_v41, %v1217_v58 }
 0x1b8   :  { %2812 = vst [vmem:[#allocation5_spill] sm:$0xff] %v2375_v35  ;;  %v2377_v32 = vpop.f32.mrf.mxu2 }
 0x1ba   :  { %v2381_v0 = vpop.f32.mrf.mxu1  ;;  %v818_v1 = vpop.f32.mrf.mxu0 }
 0x1bb   :  { %v837_v5 = vadd.f32 %v818_v1, %v472_v57 }
 0x1bd   :  { %v1218_v25 = vrot.slane %v837_v5, 7  ;;  %1863 = vmatmul.msk.bf16.gmra.mxu1 %vm282_vm3, %v2152_v43 }
 0x1bf   :  { %v2387_v44 = vsel %vm1220_vm4, %v1217_v58, %v1218_v25 }
 0x1c0   :  { %2813 = vst [vmem:[#allocation6_spill] sm:$0xff] %v2387_v44  ;;  %v2389_v12 = vpop.f32.mrf.mxu2 }
 0x1c2   :  { %v2391_v48 = vpop.f32.mrf.mxu1  ;;  %v820_v16 = vpop.f32.mrf.mxu0 }
 0x1c3   :  { %v838_v18 = vadd.f32 %v820_v16, %v474_v8  ;;  %v2411_v8 = vpop.f32.mrf.mxu3 }
 0x1c4   :  { %2816 = vst [vmem:[#allocation9_spill] sm:$0xff] %v2411_v8 }
 0x1c5   :  { %v1219_v21 = vrot.slane %v838_v18, 7  ;;  %1873 = vmatmul.msk.bf16.gmra.mxu2 %vm282_vm3, %v2178_v60 }
 0x1c7   :  { %v1236_v43 = vsel %vm1220_vm4, %v1219_v21, %v1204_v47  ;;  %v2403_v57 = vsel %vm1220_vm4, %v1218_v25, %v1219_v21 }
 0x1c8   :  { %2815 = vst [vmem:[#allocation8_spill] sm:$0xff] %v2403_v57  ;;  %v2405_v15 = vpop.f32.mrf.mxu2 }
 0x1ca   :  { %v2407_v37 = vpop.f32.mrf.mxu1 }
 0x1cb   :  { %v2419_v39 = vpop.f32.mrf.mxu3 }
 0x1cc   :  { %2817 = vst [vmem:[#allocation10_spill] sm:$0xff] %v2419_v39 }
 0x1cd   :  { %1864 = vmatmul.msk.bf16.gmra.mxu1 %vm282_vm3, %v2178_v60 }
 0x1d0   :  { %v2413_v20 = vpop.f32.mrf.mxu2 }
 0x1d2   :  { %v2415_v9 = vpop.f32.mrf.mxu1 }
 0x1d3   :  { %v2429_v60 = vpop.f32.mrf.mxu3 }
 0x1d4   :  { %2818 = vst [vmem:[#allocation11_spill] sm:$0xff] %v2429_v60 }
 0x1d5   :  { %1874 = vmatmul.msk.bf16.gmra.mxu2 %vm282_vm3, %v2199_v7 }
 0x1d8   :  { %v2421_v47 = vpop.f32.mrf.mxu2 }
 0x1da   :  { %v2423_v40 = vpop.f32.mrf.mxu1 }
 0x1db   :  { %v2439_v1 = vpop.f32.mrf.mxu3 }
 0x1dc   :  { %2819 = vst [vmem:[#allocation12_spill] sm:$0xff] %v2439_v1 }
 0x1dd   :  { %1865 = vmatmul.msk.bf16.gmra.mxu1 %vm282_vm3, %v2199_v7 }
 0x1e0   :  { %v2427_v41 = vpop.f32.mrf.mxu2 }
 0x1e2   :  { %v2431_v52 = vpop.f32.mrf.mxu1 }
 0x1e3   :  { %v648_v25 = vpop.f32.mrf.mxu3 }
 0x1e5   :  { %1875 = vmatmul.msk.bf16.gmra.mxu2 %vm282_vm3, %v2209_v10 }
 0x1e8   :  { %v2435_v53 = vpop.f32.mrf.mxu2 }
 0x1ea   :  { %v2437_v58 = vpop.f32.mrf.mxu1 }
 0x1eb   :  { %v650_v21 = vpop.f32.mrf.mxu3 }
 0x1ed   :  { %1866 = vmatmul.msk.bf16.gmra.mxu1 %vm282_vm3, %v2209_v10 }
 0x1f0   :  { %v2443_v5 = vpop.f32.mrf.mxu2 }
 0x1f1   :  { %2820 = vst [vmem:[#allocation13_spill] sm:$0xff] %v2443_v5  ;;  %v982_v5 = vadd.s32 16, %v2249_v45 }
 0x1f2   :  { %v2445_v7 = vpop.f32.mrf.mxu1 }
 0x1f3   :  { %2821 = vst [vmem:[#allocation14_spill] sm:$0xff] %v2445_v7  ;;  %v653_v44 = vpop.f32.mrf.mxu3 }
 0x1f5   :  { %1876 = vmatmul.msk.bf16.gmra.mxu2 %vm282_vm3, %v2219_v17 }
 0x1f8   :  { %v2449_v16 = vpop.f32.mrf.mxu2 }
 0x1f9   :  { %2822 = vst [vmem:[#allocation15_spill] sm:$0xff] %v2449_v16  ;;  %v649_v16 = vadd.f32 %v648_v25, %v2329_v13 }
 0x1fa   :  { %v2451_v18 = vpop.f32.mrf.mxu1 }
 0x1fb   :  { %2823 = vst [vmem:[#allocation16_spill] sm:$0xff] %v2451_v18 }
 0x1fd   :  { %1867 = vmatmul.msk.bf16.gmra.mxu1 %vm282_vm3, %v2219_v17  ;;  %v655_v17 = vpop.f32.mrf.mxu3 }
 0x200   :  { %v2455_v57 = vpop.f32.mrf.mxu2 }
 0x201   :  { %2824 = vst [vmem:[#allocation17_spill] sm:$0xff] %v2455_v57  ;;  %v1000_v57 = vand.u32 7, %v2249_v45 }
 0x202   :  { %v2457_v1 = vpop.f32.mrf.mxu1 }
 0x203   :  { %2825 = vst [vmem:[#allocation18_spill] sm:$0xff] %v2457_v1  ;;  %v543_v1 = vadd.f32 %v2331_v3, %v2229_v26  ;;  %vm1188_vm5 = vcmp.eq.s32.totalorder %v1000_v57, 0  ;;  %v545_v26 = vadd.f32 %v2345_v24, %v2239_v33  ;;  %vm1285_vm8 = vcmp.eq.s32.totalorder %v1000_v57, 7  ;;  %v2494_v33 = vld [vmem:[%s2806_s4] ss:$0 sm:$0xff] }
 0x205   :  { %1877 = vmatmul.msk.bf16.gmra.mxu2 %vm282_vm3, %v2231_v28 }
 0x208   :  { %v2461_v10 = vpop.f32.mrf.mxu2 }
 0x209   :  { %2826 = vst [vmem:[#allocation19_spill] sm:$0xff] %v2461_v10  ;;  %v981_v10 = vadd.s32 8, %v2249_v45 }
 0x20a   :  { %v2463_v60 = vpop.f32.mrf.mxu1 }
 0x20b   :  { %2827 = vst [vmem:[#allocation20_spill] sm:$0xff] %v2463_v60  ;;  %v1269_v60 = vsel %vm1188_vm5, 0.0, %v1236_v43  ;;  %v1007_v34 = vand.u32 7, %v981_v10  ;;  %v2506_v10 = vld [vmem:[%s2807_s5] ss:$0 sm:$0xff] }
 0x20d   :  { %1868 = vmatmul.msk.bf16.gmra.mxu1 %vm282_vm3, %v2231_v28  ;;  %vm1189_vm6 = vcmp.eq.s32.totalorder %v1007_v34, 0  ;;  %vm1286_vm10 = vcmp.eq.s32.totalorder %v1007_v34, 7  ;;  %v984_v34 = vadd.s32 32, %v2249_v45 }
 0x210   :  { %v2467_v35 = vpop.f32.mrf.mxu2 }
 0x211   :  { %2828 = vst [vmem:[#allocation21_spill] sm:$0xff] %v2467_v35  ;;  %v2476_v35 = vpop.f32.mrf.mxu3 }
 0x212   :  { %v2469_v39 = vpop.f32.mrf.mxu1 }
 0x213   :  { %2829 = vst [vmem:[#allocation22_spill] sm:$0xff] %v2469_v39  ;;  %v651_v39 = vadd.f32 %v650_v21, %v2343_v23  ;;  %v1270_v23 = vsel %vm1189_vm6, 0.0, %v2259_v14  ;;  %v983_v14 = vadd.s32 24, %v2249_v45 }
 0x218   :  { %v923_v19 = vpop.f32.mrf.mxu2 }
 0x219   :  { %v2479_v7 = vadd.f32 %v923_v19, %v649_v16  ;;  %v2497_v25 = vpop.f32.mrf.mxu3 }
 0x21a   :  { %v853_v18 = vpop.f32.mrf.mxu1 }
 0x21b   :  { %v893_v8 = vadd.f32 %v853_v18, %v543_v1  ;;  %v1301_v13 = vrot.slane %v2479_v7, 1  ;;  %v654_v1 = vadd.f32 %v653_v44, %v2355_v36  ;;  %v548_v18 = vadd.f32 %v2357_v4, %v2261_v54 }
 0x21d   :  { %v1382_v28 = vadd.f32 %v1269_v60, %v893_v8 }
 0x220   :  { %v925_v2 = vpop.f32.mrf.mxu2 }
 0x221   :  { %v964_v3 = vadd.f32 %v925_v2, %v651_v39  ;;  %v1014_v2 = vand.u32 7, %v982_v5 }
 0x222   :  { %v855_v43 = vpop.f32.mrf.mxu1 }
 0x223   :  { %v1302_v8 = vrot.slane %v964_v3, 1  ;;  %v894_v60 = vadd.f32 %v855_v43, %v545_v26  ;;  %vm1190_vm9 = vcmp.eq.s32.totalorder %v1014_v2, 0  ;;  %v1021_v3 = vand.u32 7, %v983_v14 }
 0x224   :  { %vm1287_vm12 = vcmp.eq.s32.totalorder %v1014_v2, 7  ;;  %v553_v2 = vadd.f32 %v2381_v0, %v2283_v62 }
 0x225   :  { %v1332_v19 = vsel %vm1317_vm7, %v1301_v13, %v1302_v8  ;;  %v1383_v24 = vadd.f32 %v1270_v23, %v894_v60  ;;  %v656_v23 = vadd.f32 %v655_v17, %v2367_v51  ;;  %vm2513_vm11 = vcmp.eq.s32.totalorder %v1021_v3, 0 }
 0x226   :  { %v1366_v39 = vsel %vm1285_vm8, 0.0, %v1332_v19  ;;  %vm1288_vm14 = vcmp.eq.s32.totalorder %v1021_v3, 7 }
 0x227   :  { %v1398_v57 = vadd.f32 %v1382_v28, %v1366_v39  ;;  %v1271_v28 = vsel %vm1190_vm9, 0.0, %v2269_v30  ;;  %v550_v30 = vadd.f32 %v2369_v49, %v2271_v6 }
 0x228   :  { %v928_v16 = vpop.f32.mrf.mxu2 }
 0x229   :  { %v1427_v21 = vmul.f32 %v2494_v33, %v1398_v57  ;;  %v965_v5 = vadd.f32 %v928_v16, %v654_v1 }
 0x22a   :  { %v858_v26 = vpop.f32.mrf.mxu1 }
 0x22b   :  { %v1303_v36 = vrot.slane %v965_v5, 1  ;;  %v895_v44 = vadd.f32 %v858_v26, %v548_v18  ;;  %v1449_v43 = vadd.f32 %v2506_v10, %v1427_v21  ;;  %v1028_v5 = vand.u32 7, %v984_v34 }
 0x22d   :  { %v1331_v54 = vsel %vm1317_vm7, %v1302_v8, %v1303_v36  ;;  %v1384_v4 = vadd.f32 %v1271_v28, %v895_v44  ;;  %v1465_v57 = vmax.f32 %v1449_v43, 0.0  ;;  %v663_v8 = vpop.f32.mrf.mxu3  ;;  %v659_v43 = vadd.f32 %v2476_v35, %v2377_v32 }
 0x22e   :  { %v1367_v60 = vsel %vm1286_vm10, 0.0, %v1331_v54  ;;  %vm1192_vm13 = vcmp.eq.s32.totalorder %v1028_v5, 0  ;;  %vm1289_vm1 = vcmp.eq.s32.totalorder %v1028_v5, 7  ;;  %v558_v5 = vadd.f32 %v2407_v37, %v2305_v50 }
 0x22f   :  { %v1399_v19 = vadd.f32 %v1383_v24, %v1367_v60  ;;  %v1272_v24 = vsel %vm2513_vm11, 0.0, %v2277_v11  ;;  %v1481_v26 = vpack.c.bf16 %v1465_v57, %v1465_v57  ;;  %v985_v11 = vadd.s32 40, %v2249_v45 }
 0x230   :  { %v930_v39 = vpop.f32.mrf.mxu2  ;;  %v1273_v32 = vsel %vm1192_vm13, 0.0, %v2287_v42  ;;  %v555_v42 = vadd.f32 %v2391_v48, %v2295_v55 }
 0x231   :  { %v1428_v16 = vmul.f32 %v2494_v33, %v1399_v19  ;;  %v966_v14 = vadd.f32 %v930_v39, %v656_v23  ;;  %v1534_v19 = vunpack.c.l.b16 %v1481_v26 }
 0x232   :  { %v860_v18 = vpop.f32.mrf.mxu1 }
 0x233   :  { %v1450_v21 = vadd.f32 %v2506_v10, %v1428_v16  ;;  %v1304_v51 = vrot.slane %v966_v14, 1  ;;  %v896_v17 = vadd.f32 %v860_v18, %v550_v30 }
 0x235   :  { %v1466_v44 = vmax.f32 %v1450_v21, 0.0  ;;  %v1330_v6 = vsel %vm1317_vm7, %v1303_v36, %v1304_v51  ;;  %v1385_v49 = vadd.f32 %v1272_v24, %v896_v17  ;;  %v665_v35 = vpop.f32.mrf.mxu3  ;;  %v661_v21 = vadd.f32 %v2497_v25, %v2389_v12 }
 0x236   :  { %v1368_v28 = vsel %vm1287_vm12, 0.0, %v1330_v6  ;;  %v986_v24 = vadd.s32 48, %v2249_v45 }
 0x237   :  { %v1482_v54 = vpack.c.bf16 %v1466_v44, %v1466_v44  ;;  %v1400_v60 = vadd.f32 %v1384_v4, %v1368_v28  ;;  %v1035_v4 = vand.u32 7, %v985_v11  ;;  %v664_v11 = vadd.f32 %v663_v8, %v2405_v15 }
 0x238   :  { %v933_v23 = vpop.f32.mrf.mxu2  ;;  %v1042_v25 = vand.u32 7, %v986_v24  ;;  %v988_v24 = vadd.s32 64, %v2249_v45 }
 0x239   :  { %v1535_v39 = vunpack.c.l.b16 %v1482_v54  ;;  %v1429_v1 = vmul.f32 %v2494_v33, %v1400_v60  ;;  %v967_v34 = vadd.f32 %v933_v23, %v659_v43  ;;  %vm1193_vm15 = vcmp.eq.s32.totalorder %v1035_v4, 0 }
 0x23a   :  { %v863_v36 = vpop.f32.mrf.mxu1  ;;  %v1274_v12 = vsel %vm1193_vm15, 0.0, %v2293_v27  ;;  %vm1194_vm2 = vcmp.eq.s32.totalorder %v1042_v25, 0  ;;  %v987_v27 = vadd.s32 56, %v2249_v45  ;;  %vm1290_vm4 = vcmp.eq.s32.totalorder %v1035_v4, 7 }
 0x23b   :  { %v1550_v30 = vpack.c.b16 %v1535_v39, %v1534_v19  ;;  %v1305_v57 = vrot.slane %v967_v34, 1  ;;  %v897_v16 = vadd.f32 %v863_v36, %v553_v2  ;;  %v1451_v14 = vadd.f32 %v2506_v10, %v1429_v1 }
 0x23c   :  { %v1275_v15 = vsel %vm1194_vm2, 0.0, %v2303_v59  ;;  %v1049_v8 = vand.u32 7, %v987_v27  ;;  %v560_v59 = vadd.f32 %v2415_v9, %v2315_v46  ;;  %vm1291_vm6 = vcmp.eq.s32.totalorder %v1042_v25, 7 }
 0x23d   :  { %v1329_v62 = vsel %vm1317_vm7, %v1304_v51, %v1305_v57  ;;  %v1386_v0 = vadd.f32 %v1273_v32, %v897_v16  ;;  %1878 = vmatmul.msk.bf16.vlgmr.msra.gmra.mxu3 %vm282_vm3, %v1550_v30  ;;  %v1467_v44 = vmax.f32 %v1451_v14, 0.0  ;;  %v668_v55 = vpop.f32.mrf.mxu3  ;;  %v563_v25 = vadd.f32 %v2423_v40, %v2347_v29 }
 0x23e   :  { %v1369_v18 = vsel %vm1288_vm14, 0.0, %v1329_v62  ;;  %vm1195_vm5 = vcmp.eq.s32.totalorder %v1049_v8, 0  ;;  %v669_v9 = vadd.f32 %v668_v55, %v2421_v47  ;;  %vm1292_vm9 = vcmp.eq.s32.totalorder %v1049_v8, 7 }
 0x23f   :  { %v1401_v17 = vadd.f32 %v1385_v49, %v1369_v18  ;;  %v1483_v23 = vpack.c.bf16 %v1467_v44, %v1467_v44  ;;  %v565_v8 = vadd.f32 %v2431_v52, %v2361_v22  ;;  %v2595_v22 = vld [vmem:[%s2806_s4 + $0x1] ss:$0 sm:$0xff] }
 0x240   :  { %v935_v3 = vpop.f32.mrf.mxu2 }
 0x241   :  { %v1430_v26 = vmul.f32 %v2494_v33, %v1401_v17  ;;  %v968_v51 = vadd.f32 %v935_v3, %v661_v21  ;;  %v1536_v30 = vunpack.c.l.b16 %v1483_v23  ;;  %v666_v21 = vadd.f32 %v665_v35, %v2413_v20 }
 0x242   :  { %v865_v6 = vpop.f32.mrf.mxu1  ;;  %v1276_v20 = vsel %vm1195_vm5, 0.0, %v2311_v38  ;;  %v1056_v35 = vand.u32 7, %v988_v24 }
 0x243   :  { %v1306_v28 = vrot.slane %v968_v51, 1  ;;  %v898_v43 = vadd.f32 %v865_v6, %v555_v42  ;;  %v1452_v54 = vadd.f32 %v2506_v10, %v1430_v26 }
 0x244   :  { %vm1196_vm8 = vcmp.eq.s32.totalorder %v1056_v35, 0  ;;  %vm1293_vm11 = vcmp.eq.s32.totalorder %v1056_v35, 7 }
 0x245   :  { %v1328_v49 = vsel %vm1317_vm7, %v1305_v57, %v1306_v28  ;;  %v1387_v60 = vadd.f32 %v1274_v12, %v898_v43  ;;  %v1468_v2 = vmax.f32 %v1452_v54, 0.0  ;;  %v670_v3 = vpop.f32.mrf.mxu3  ;;  %v1277_v55 = vsel %vm1196_vm8, 0.0, %v2321_v31 }
 0x246   :  { %v1370_v48 = vsel %vm1289_vm1, 0.0, %v1328_v49  ;;  %v990_v31 = vadd.s32 80, %v2249_v45 }
 0x247   :  { %v1402_v19 = vadd.f32 %v1386_v0, %v1370_v48  ;;  %v1484_v39 = vpack.c.bf16 %v1468_v2, %v1468_v2 }
 0x248   :  { %v938_v1 = vpop.f32.mrf.mxu2  ;;  %v1070_v24 = vand.u32 7, %v990_v31 }
 0x249   :  { %v1431_v34 = vmul.f32 %v2494_v33, %v1402_v19  ;;  %v969_v36 = vadd.f32 %v938_v1, %v664_v11  ;;  %v1537_v57 = vunpack.c.l.b16 %v1484_v39  ;;  %v989_v11 = vadd.s32 72, %v2249_v45 }
 0x24a   :  { %v868_v16 = vpop.f32.mrf.mxu1  ;;  %vm1198_vm12 = vcmp.eq.s32.totalorder %v1070_v24, 0  ;;  %vm1295_vm15 = vcmp.eq.s32.totalorder %v1070_v24, 7  ;;  %v993_v24 = vadd.s32 104, %v2249_v45 }
 0x24b   :  { %v1307_v32 = vrot.slane %v969_v36, 1  ;;  %v899_v62 = vadd.f32 %v868_v16, %v558_v5  ;;  %v1551_v14 = vpack.c.b16 %v1537_v57, %v1536_v30  ;;  %v1453_v0 = vadd.f32 %v2506_v10, %v1431_v34 }
 0x24c   :  { %v1063_v30 = vand.u32 7, %v989_v11  ;;  %v2834_v11 = vld [vmem:[#allocation13_spill] sm:$0xff] }
 0x24d   :  { %v1327_v50 = vsel %vm1317_vm7, %v1306_v28, %v1307_v32  ;;  %v1388_v37 = vadd.f32 %v1275_v15, %v899_v62  ;;  %1879 = vmatmul.msk.bf16.gmra.mxu3 %vm282_vm3, %v1551_v14  ;;  %v1469_v51 = vmax.f32 %v1453_v0, 0.0  ;;  %v673_v1 = vpop.f32.mrf.mxu3 }
 0x24e   :  { %v1371_v18 = vsel %vm1290_vm4, 0.0, %v1327_v50  ;;  %vm2578_vm10 = vcmp.eq.s32.totalorder %v1063_v30, 0  ;;  %vm1294_vm13 = vcmp.eq.s32.totalorder %v1063_v30, 7 }
 0x24f   :  { %v1403_v17 = vadd.f32 %v1387_v60, %v1371_v18  ;;  %v1485_v60 = vpack.c.bf16 %v1469_v51, %v1469_v51 }
 0x250   :  { %v940_v4 = vpop.f32.mrf.mxu2 }
 0x251   :  { %v1432_v42 = vmul.f32 %v2494_v33, %v1403_v17  ;;  %v970_v26 = vadd.f32 %v940_v4, %v666_v21  ;;  %v1538_v39 = vunpack.c.l.b16 %v1485_v60  ;;  %v1278_v4 = vsel %vm2578_vm10, 0.0, %v2327_v56 }
 0x252   :  { %v870_v44 = vpop.f32.mrf.mxu1  ;;  %v568_v56 = vadd.f32 %v2437_v58, %v2379_v63  ;;  %v1279_v63 = vsel %vm1198_vm12, 0.0, %v2341_v61  ;;  %v2836_v61 = vld [vmem:[#allocation14_spill] sm:$0xff] }
 0x253   :  { %v1308_v6 = vrot.slane %v970_v26, 1  ;;  %v900_v28 = vadd.f32 %v870_v44, %v560_v59  ;;  %v1454_v43 = vadd.f32 %v2506_v10, %v1432_v42 }
 0x255   :  { %v1326_v54 = vsel %vm1317_vm7, %v1307_v32, %v1308_v6  ;;  %v1389_v12 = vadd.f32 %v1276_v20, %v900_v28  ;;  %v1470_v49 = vmax.f32 %v1454_v43, 0.0  ;;  %v671_v32 = vadd.f32 %v670_v3, %v2427_v41  ;;  %v675_v3 = vpop.f32.mrf.mxu3 }
 0x256   :  { %v1372_v46 = vsel %vm1291_vm6, 0.0, %v1326_v54  ;;  %v991_v28 = vadd.s32 88, %v2249_v45 }
 0x257   :  { %v1404_v2 = vadd.f32 %v1388_v37, %v1372_v46  ;;  %v1486_v23 = vpack.c.bf16 %v1470_v49, %v1470_v49 }
 0x258   :  { %v943_v48 = vpop.f32.mrf.mxu2  ;;  %v1077_v58 = vand.u32 7, %v991_v28  ;;  %v1091_v28 = vand.u32 7, %v993_v24 }
 0x259   :  { %v1433_v38 = vmul.f32 %v2494_v33, %v1404_v2  ;;  %v971_v19 = vadd.f32 %v943_v48, %v669_v9  ;;  %v1539_v5 = vunpack.c.l.b16 %v1486_v23 }
 0x25a   :  { %v873_v27 = vpop.f32.mrf.mxu1  ;;  %vm1199_vm14 = vcmp.eq.s32.totalorder %v1077_v58, 0  ;;  %vm1296_vm2 = vcmp.eq.s32.totalorder %v1077_v58, 7  ;;  %vm1201_vm4 = vcmp.eq.s32.totalorder %v1091_v28, 0  ;;  %v2843_v58 = vld [vmem:[#allocation10_spill] sm:$0xff]  ;;  %vm1298_vm8 = vcmp.eq.s32.totalorder %v1091_v28, 7  ;;  %v2851_v28 = vld [vmem:[#allocation12_spill] sm:$0xff] }
 0x25b   :  { %v1309_v34 = vrot.slane %v971_v19, 1  ;;  %v901_v36 = vadd.f32 %v873_v27, %v563_v25  ;;  %v1552_v47 = vpack.c.b16 %v1539_v5, %v1538_v39  ;;  %v1455_v57 = vadd.f32 %v2506_v10, %v1433_v38 }
 0x25c   :  { %v676_v38 = vadd.f32 %v675_v3, %v2834_v11  ;;  %v992_v5 = vadd.s32 96, %v2249_v45 }
 0x25d   :  { %v1325_v29 = vsel %vm1317_vm7, %v1308_v6, %v1309_v34  ;;  %v1390_v40 = vadd.f32 %v1277_v55, %v901_v36  ;;  %1880 = vmatmul.msk.bf16.gmra.mxu3 %vm282_vm3, %v1552_v47  ;;  %v1471_v0 = vmax.f32 %v1455_v57, 0.0  ;;  %v678_v25 = vpop.f32.mrf.mxu3  ;;  %v2837_v57 = vld [vmem:[#allocation3_spill] sm:$0xff] }
 0x25e   :  { %v1373_v16 = vsel %vm1292_vm9, 0.0, %v1325_v29 }
 0x25f   :  { %v1405_v62 = vadd.f32 %v1389_v12, %v1373_v16  ;;  %v1487_v42 = vpack.c.bf16 %v1471_v0, %v1471_v0  ;;  %v2605_v12 = vld [vmem:[%s2807_s5 + $0x1] ss:$0 sm:$0xff]  ;;  %v1280_v16 = vsel %vm1199_vm14, 0.0, %v2837_v57 }
 0x260   :  { %v945_v14 = vpop.f32.mrf.mxu2 }
 0x261   :  { %v1434_v50 = vmul.f32 %v2494_v33, %v1405_v62  ;;  %v972_v37 = vadd.f32 %v945_v14, %v671_v32  ;;  %v1540_v35 = vunpack.c.l.b16 %v1487_v42  ;;  %v1084_v32 = vand.u32 7, %v992_v5 }
 0x262   :  { %v875_v18 = vpop.f32.mrf.mxu1 }
 0x263   :  { %v1310_v21 = vrot.slane %v972_v37, 1  ;;  %v902_v17 = vadd.f32 %v875_v18, %v565_v8  ;;  %v1456_v41 = vadd.f32 %v2506_v10, %v1434_v50  ;;  %v674_v10 = vadd.f32 %v673_v1, %v2435_v53  ;;  %v2835_v1 = vld [vmem:[#allocation7_spill] sm:$0xff] }
 0x264   :  { %v570_v27 = vadd.f32 %v2836_v61, %v2835_v1  ;;  %v2838_v50 = vld [vmem:[#allocation15_spill] sm:$0xff]  ;;  %vm1200_vm1 = vcmp.eq.s32.totalorder %v1084_v32, 0  ;;  %vm1297_vm5 = vcmp.eq.s32.totalorder %v1084_v32, 7  ;;  %v2845_v1 = vld [vmem:[#allocation5_spill] sm:$0xff]  ;;  %v2848_v32 = vld [vmem:[#allocation20_spill] sm:$0xff] }
 0x265   :  { %v1324_v59 = vsel %vm1317_vm7, %v1309_v34, %v1310_v21  ;;  %v1391_v52 = vadd.f32 %v1278_v4, %v902_v17  ;;  %v1472_v33 = vmax.f32 %v1456_v41, 0.0  ;;  %v679_v37 = vadd.f32 %v678_v25, %v2838_v50  ;;  %v2840_v17 = vld [vmem:[#allocation16_spill] sm:$0xff]  ;;  %v680_v3 = vpop.f32.mrf.mxu3 }
 0x266   :  { %v1374_v26 = vsel %vm1293_vm11, 0.0, %v1324_v59  ;;  %v1282_v61 = vsel %vm1201_vm4, 0.0, %v2845_v1 }
 0x267   :  { %v1406_v51 = vadd.f32 %v1390_v40, %v1374_v26  ;;  %v1488_v44 = vpack.c.bf16 %v1472_v33, %v1472_v33 }
 0x268   :  { %v948_v6 = vpop.f32.mrf.mxu2 }
 0x269   :  { %v1435_v43 = vmul.f32 %v2595_v22, %v1406_v51  ;;  %v973_v20 = vadd.f32 %v948_v6, %v674_v10  ;;  %v1541_v54 = vunpack.c.l.b16 %v1488_v44 }
 0x26a   :  { %v878_v53 = vpop.f32.mrf.mxu1 }
 0x26b   :  { %v1311_v49 = vrot.slane %v973_v20, 1  ;;  %v903_v60 = vadd.f32 %v878_v53, %v568_v56  ;;  %v1553_v46 = vpack.c.b16 %v1541_v54, %v1540_v35  ;;  %v1457_v23 = vadd.f32 %v2605_v12, %v1435_v43  ;;  %v2841_v56 = vld [vmem:[#allocation4_spill] sm:$0xff]  ;;  %v2842_v53 = vld [vmem:[#allocation17_spill] sm:$0xff] }
 0x26c   :  { %v1281_v6 = vsel %vm1200_vm1, 0.0, %v2841_v56 }
 0x26d   :  { %v1323_v9 = vsel %vm1317_vm7, %v1310_v21, %v1311_v49  ;;  %v1392_v2 = vadd.f32 %v1279_v63, %v903_v60  ;;  %1881 = vmatmul.msk.bf16.gmra.mxu3 %vm282_vm3, %v1553_v46  ;;  %v1473_v47 = vmax.f32 %v1457_v23, 0.0  ;;  %v2839_v21 = vld [vmem:[#allocation9_spill] sm:$0xff]  ;;  %v994_v63 = vadd.s32 112, %v2249_v45  ;;  %v683_v11 = vpop.f32.mrf.mxu3 }
 0x26e   :  { %v1375_v48 = vsel %vm1294_vm13, 0.0, %v1323_v9  ;;  %v573_v41 = vadd.f32 %v2840_v17, %v2839_v21  ;;  %v2844_v9 = vld [vmem:[#allocation18_spill] sm:$0xff] }
 0x26f   :  { %v1407_v19 = vadd.f32 %v1391_v52, %v1375_v48  ;;  %v1489_v31 = vpack.c.bf16 %v1473_v47, %v1473_v47 }
 0x270   :  { %v950_v39 = vpop.f32.mrf.mxu2 }
 0x271   :  { %v1436_v34 = vmul.f32 %v2595_v22, %v1407_v19  ;;  %v974_v36 = vadd.f32 %v950_v39, %v676_v38  ;;  %v1542_v33 = vunpack.c.l.b16 %v1489_v31  ;;  %v995_v31 = vadd.s32 120, %v2249_v45 }
 0x272   :  { %v880_v55 = vpop.f32.mrf.mxu1 }
 0x273   :  { %v1312_v30 = vrot.slane %v974_v36, 1  ;;  %v904_v29 = vadd.f32 %v880_v55, %v570_v27  ;;  %v1458_v40 = vadd.f32 %v2605_v12, %v1436_v34  ;;  %v1098_v27 = vand.u32 7, %v994_v63  ;;  %v2853_v63 = vld [vmem:[#allocation8_spill] sm:$0xff] }
 0x275   :  { %v1322_v62 = vsel %vm1317_vm7, %v1311_v49, %v1312_v30  ;;  %v1393_v14 = vadd.f32 %v1280_v16, %v904_v29  ;;  %v1474_v15 = vmax.f32 %v1458_v40, 0.0  ;;  %v681_v49 = vadd.f32 %v680_v3, %v2842_v53  ;;  %v2846_v29 = vld [vmem:[#allocation19_spill] sm:$0xff]  ;;  %v685_v3 = vpop.f32.mrf.mxu3 }
 0x276   :  { %v1376_v8 = vsel %vm1295_vm15, 0.0, %v1322_v62  ;;  %v684_v40 = vadd.f32 %v683_v11, %v2846_v29  ;;  %v2847_v62 = vld [vmem:[#allocation11_spill] sm:$0xff]  ;;  %vm1202_vm6 = vcmp.eq.s32.totalorder %v1098_v27, 0  ;;  %vm1299_vm10 = vcmp.eq.s32.totalorder %v1098_v27, 7 }
 0x277   :  { %v1408_v0 = vadd.f32 %v1392_v2, %v1376_v8  ;;  %v1490_v18 = vpack.c.bf16 %v1474_v15, %v1474_v15  ;;  %v575_v2 = vadd.f32 %v2844_v9, %v2843_v58 }
 0x278   :  { %v953_v4 = vpop.f32.mrf.mxu2 }
 0x279   :  { %v1437_v59 = vmul.f32 %v2595_v22, %v1408_v0  ;;  %v975_v52 = vadd.f32 %v953_v4, %v679_v37  ;;  %v1543_v42 = vunpack.c.l.b16 %v1490_v18  ;;  %v2849_v4 = vld [vmem:[#allocation6_spill] sm:$0xff] }
 0x27a   :  { %v883_v26 = vpop.f32.mrf.mxu1  ;;  %v1283_v24 = vsel %vm1202_vm6, 0.0, %v2849_v4 }
 0x27b   :  { %v1313_v10 = vrot.slane %v975_v52, 1  ;;  %v905_v51 = vadd.f32 %v883_v26, %v573_v41  ;;  %v1554_v44 = vpack.c.b16 %v1543_v42, %v1542_v33  ;;  %v1459_v35 = vadd.f32 %v2605_v12, %v1437_v59 }
 0x27c   :  { %v1105_v42 = vand.u32 7, %v995_v31 }
 0x27d   :  { %v1321_v43 = vsel %vm1317_vm7, %v1312_v30, %v1313_v10  ;;  %v1394_v20 = vadd.f32 %v1281_v6, %v905_v51  ;;  %1882 = vmatmul.msk.bf16.gmra.mxu3 %vm282_vm3, %v1554_v44  ;;  %v1475_v48 = vmax.f32 %v1459_v35, 0.0 }
 0x27e   :  { %v1377_v54 = vsel %vm1296_vm2, 0.0, %v1321_v43  ;;  %v2852_v43 = vld [vmem:[#allocation22_spill] sm:$0xff]  ;;  %vm1203_vm9 = vcmp.eq.s32.totalorder %v1105_v42, 0  ;;  %vm1300_vm11 = vcmp.eq.s32.totalorder %v1105_v42, 7 }
 0x27f   :  { %v1409_v60 = vadd.f32 %v1393_v14, %v1377_v54  ;;  %v1491_v55 = vpack.c.bf16 %v1475_v48, %v1475_v48  ;;  %v578_v14 = vadd.f32 %v2848_v32, %v2847_v62  ;;  %v1284_v58 = vsel %vm1203_vm9, 0.0, %v2853_v63 }
 0x280   :  { %v955_v46 = vpop.f32.mrf.mxu2 }
 0x281   :  { %v1438_v23 = vmul.f32 %v2595_v22, %v1409_v60  ;;  %v976_v25 = vadd.f32 %v955_v46, %v681_v49  ;;  %v1544_v37 = vunpack.c.l.b16 %v1491_v55 }
 0x282   :  { %v885_v38 = vpop.f32.mrf.mxu1 }
 0x283   :  { %v1314_v19 = vrot.slane %v976_v25, 1  ;;  %v906_v39 = vadd.f32 %v885_v38, %v575_v2  ;;  %v1460_v5 = vadd.f32 %v2605_v12, %v1438_v23 }
 0x285   :  { %v1320_v34 = vsel %vm1317_vm7, %v1313_v10, %v1314_v19  ;;  %v1395_v36 = vadd.f32 %v1282_v61, %v906_v39  ;;  %v1476_v47 = vmax.f32 %v1460_v5, 0.0  ;;  %v2850_v10 = vld [vmem:[#allocation21_spill] sm:$0xff] }
 0x286   :  { %v1378_v30 = vsel %vm1297_vm5, 0.0, %v1320_v34  ;;  %v686_v51 = vadd.f32 %v685_v3, %v2850_v10 }
 0x287   :  { %v1410_v57 = vadd.f32 %v1394_v20, %v1378_v30  ;;  %v1492_v16 = vpack.c.bf16 %v1476_v47, %v1476_v47  ;;  %v580_v20 = vadd.f32 %v2852_v43, %v2851_v28 }
 0x288   :  { %v958_v15 = vpop.f32.mrf.mxu2 }
 0x289   :  { %v1439_v8 = vmul.f32 %v2595_v22, %v1410_v57  ;;  %v977_v50 = vadd.f32 %v958_v15, %v684_v40  ;;  %v1545_v0 = vunpack.c.l.b16 %v1492_v16 }
 0x28a   :  { %v888_v18 = vpop.f32.mrf.mxu1 }
 0x28b   :  { %v1315_v21 = vrot.slane %v977_v50, 1  ;;  %v907_v17 = vadd.f32 %v888_v18, %v578_v14  ;;  %v1555_v41 = vpack.c.b16 %v1545_v0, %v1544_v37  ;;  %v1461_v59 = vadd.f32 %v2605_v12, %v1439_v8 }
 0x28d   :  { %v1319_v52 = vsel %vm1317_vm7, %v1314_v19, %v1315_v21  ;;  %v1396_v33 = vadd.f32 %v1283_v24, %v907_v17  ;;  %1883 = vmatmul.msk.bf16.gmra.mxu3 %vm282_vm3, %v1555_v41  ;;  %v1477_v6 = vmax.f32 %v1461_v59, 0.0 }
 0x28e   :  { %v1379_v26 = vsel %vm1298_vm8, 0.0, %v1319_v52 }
 0x28f   :  { %v1411_v44 = vadd.f32 %v1395_v36, %v1379_v26  ;;  %v1493_v9 = vpack.c.bf16 %v1477_v6, %v1477_v6 }
 0x290   :  { %v960_v56 = vpop.f32.mrf.mxu2 }
 0x291   :  { %v1440_v35 = vmul.f32 %v2595_v22, %v1411_v44  ;;  %v978_v54 = vadd.f32 %v960_v56, %v686_v51  ;;  %v1546_v27 = vunpack.c.l.b16 %v1493_v9 }
 0x292   :  { %v890_v53 = vpop.f32.mrf.mxu1 }
 0x293   :  { %v1316_v49 = vrot.slane %v978_v54, 1  ;;  %v908_v60 = vadd.f32 %v890_v53, %v580_v20  ;;  %v1462_v46 = vadd.f32 %v2605_v12, %v1440_v35 }
 0x295   :  { %v1318_v2 = vsel %vm1317_vm7, %v1315_v21, %v1316_v49  ;;  %v1333_v23 = vsel %vm1317_vm7, %v1316_v49, %v1301_v13  ;;  %v1397_v25 = vadd.f32 %v1284_v58, %v908_v60  ;;  %v1478_v48 = vmax.f32 %v1462_v46, 0.0 }
 0x296   :  { %v1380_v11 = vsel %vm1299_vm10, 0.0, %v1318_v2  ;;  %v1381_v38 = vsel %vm1300_vm11, 0.0, %v1333_v23 }
 0x297   :  { %v1412_v19 = vadd.f32 %v1396_v33, %v1380_v11  ;;  %v1413_v39 = vadd.f32 %v1397_v25, %v1381_v38  ;;  %v1494_v5 = vpack.c.bf16 %v1478_v48, %v1478_v48 }
 0x299   :  { %v1441_v1 = vmul.f32 %v2595_v22, %v1412_v19  ;;  %v1442_v61 = vmul.f32 %v2595_v22, %v1413_v39  ;;  %v1547_v34 = vunpack.c.l.b16 %v1494_v5  ;;  %v2671_v22 = vld [vmem:[%s2808_s7] ss:$0 sm:$0xff] }
 0x29b   :  { %v1464_v36 = vadd.f32 %v2605_v12, %v1442_v61  ;;  %v1556_v47 = vpack.c.b16 %v1547_v34, %v1546_v27  ;;  %v1463_v7 = vadd.f32 %v2605_v12, %v1441_v1  ;;  %v1498_v12 = vld [vmem:[%s2802_s0] sm:$0xff] }
 0x29d   :  { %v1480_v45 = vmax.f32 %v1464_v36, 0.0  ;;  %1884 = vmatmul.msk.bf16.gmra.mxu3 %vm282_vm3, %v1556_v47  ;;  %v1479_v13 = vmax.f32 %v1463_v7, 0.0 }
 0x29f   :  { %v1496_v55 = vpack.c.bf16 %v1480_v45, %v1480_v45  ;;  %v1495_v30 = vpack.c.bf16 %v1479_v13, %v1479_v13 }
 0x2a1   :  { %v1548_v29 = vunpack.c.l.b16 %v1495_v30  ;;  %v1549_v40 = vunpack.c.l.b16 %v1496_v55 }
 0x2a3   :  { %v1557_v57 = vpack.c.b16 %v1549_v40, %v1548_v29 }
 0x2ad   :  { %1885 = vmatmul.msk.bf16.gmra.mxu3 %vm282_vm3, %v1557_v57 }
 0x2c0   :  { %v1594_v16 = vpop.f32.mrf.mxu3 }
 0x2c1   :  { %v1595_v62 = vadd.f32 %v2671_v22, %v1594_v16 }
 0x2c3   :  { %v1634_v32 = vadd.f32 %v1595_v62, %v1498_v12 }
 0x2c5   :  { %v1650_v14 = vmax.f32 %v1634_v32, 0.0 }
 0x2c7   :  { %1666 = vst.msk [vmem:[%s2809_s8] sm:$0xff] %vm74_vm0, %v1650_v14 }
 0x2c8   :  { %v1596_v31 = vpop.f32.mrf.mxu3 }
 0x2c9   :  { %v1597_v8 = vadd.f32 %v2671_v22, %v1596_v31 }
 0x2ce   :  { %v1499_v15 = vld [vmem:[%s2802_s0 + $0x8] sm:$0xff] }
 0x2cf   :  { %v1635_v50 = vadd.f32 %v1597_v8, %v1499_v15 }
 0x2d0   :  { %v1599_v18 = vpop.f32.mrf.mxu3 }
 0x2d1   :  { %v1651_v37 = vmax.f32 %v1635_v50, 0.0  ;;  %v1600_v21 = vadd.f32 %v2671_v22, %v1599_v18 }
 0x2d3   :  { %1667 = vst.msk [vmem:[%s2809_s8 + $0x8] sm:$0xff] %vm74_vm0, %v1651_v37 }
 0x2d8   :  { %v1601_v4 = vpop.f32.mrf.mxu3 }
 0x2d9   :  { %v1602_v24 = vadd.f32 %v2671_v22, %v1601_v4 }
 0x2da   :  { %v1500_v0 = vld [vmem:[%s2802_s0 + $0x10] sm:$0xff] }
 0x2db   :  { %v1636_v17 = vadd.f32 %v1600_v21, %v1500_v0 }
 0x2dd   :  { %v1652_v41 = vmax.f32 %v1636_v17, 0.0 }
 0x2df   :  { %1668 = vst.msk [vmem:[%s2809_s8 + $0x10] sm:$0xff] %vm74_vm0, %v1652_v41 }
 0x2e0   :  { %v1604_v42 = vpop.f32.mrf.mxu3 }
 0x2e1   :  { %v1605_v26 = vadd.f32 %v2671_v22, %v1604_v42 }
 0x2e6   :  { %v1501_v3 = vld [vmem:[%s2802_s0 + $0x18] sm:$0xff] }
 0x2e7   :  { %v1637_v59 = vadd.f32 %v1602_v24, %v1501_v3 }
 0x2e8   :  { %v1606_v56 = vpop.f32.mrf.mxu3 }
 0x2e9   :  { %v1653_v52 = vmax.f32 %v1637_v59, 0.0  ;;  %v1607_v6 = vadd.f32 %v2671_v22, %v1606_v56 }
 0x2eb   :  { %1669 = vst.msk [vmem:[%s2809_s8 + $0x18] sm:$0xff] %vm74_vm0, %v1653_v52 }
 0x2f0   :  { %v1609_v35 = vpop.f32.mrf.mxu3 }
 0x2f1   :  { %v1610_v54 = vadd.f32 %v2671_v22, %v1609_v35 }
 0x2f2   :  { %v1502_v33 = vld [vmem:[%s2802_s0 + $0x20] sm:$0xff] }
 0x2f3   :  { %v1638_v10 = vadd.f32 %v1605_v26, %v1502_v33 }
 0x2f5   :  { %v1654_v51 = vmax.f32 %v1638_v10, 0.0 }
 0x2f7   :  { %1670 = vst.msk [vmem:[%s2809_s8 + $0x20] sm:$0xff] %vm74_vm0, %v1654_v51 }
 0x2f8   :  { %v1611_v46 = vpop.f32.mrf.mxu3 }
 0x2f9   :  { %v1612_v63 = vadd.f32 %v2671_v22, %v1611_v46 }
 0x2fe   :  { %v1503_v44 = vld [vmem:[%s2802_s0 + $0x28] sm:$0xff] }
 0x2ff   :  { %v1639_v28 = vadd.f32 %v1607_v6, %v1503_v44 }
 0x300   :  { %v1614_v23 = vpop.f32.mrf.mxu3 }
 0x301   :  { %v1655_v43 = vmax.f32 %v1639_v28, 0.0  ;;  %v1615_v25 = vadd.f32 %v2671_v22, %v1614_v23 }
 0x303   :  { %1671 = vst.msk [vmem:[%s2809_s8 + $0x28] sm:$0xff] %vm74_vm0, %v1655_v43 }
 0x308   :  { %v1616_v19 = vpop.f32.mrf.mxu3 }
 0x309   :  { %v1617_v39 = vadd.f32 %v2671_v22, %v1616_v19 }
 0x30a   :  { %v1504_v20 = vld [vmem:[%s2802_s0 + $0x30] sm:$0xff] }
 0x30b   :  { %v1640_v53 = vadd.f32 %v1610_v54, %v1504_v20 }
 0x30d   :  { %v1656_v49 = vmax.f32 %v1640_v53, 0.0 }
 0x30f   :  { %1672 = vst.msk [vmem:[%s2809_s8 + $0x30] sm:$0xff] %vm74_vm0, %v1656_v49 }
 0x310   :  { %v1619_v27 = vpop.f32.mrf.mxu3 }
 0x311   :  { %v1620_v34 = vadd.f32 %v2671_v22, %v1619_v27 }
 0x316   :  { %v1505_v60 = vld [vmem:[%s2802_s0 + $0x38] sm:$0xff] }
 0x317   :  { %v1641_v58 = vadd.f32 %v1612_v63, %v1505_v60 }
 0x318   :  { %v1621_v45 = vpop.f32.mrf.mxu3 }
 0x319   :  { %v1657_v9 = vmax.f32 %v1641_v58, 0.0  ;;  %v1622_v13 = vadd.f32 %v2671_v22, %v1621_v45 }
 0x31b   :  { %1673 = vst.msk [vmem:[%s2809_s8 + $0x38] sm:$0xff] %vm74_vm0, %v1657_v9 }
 0x320   :  { %v1624_v40 = vpop.f32.mrf.mxu3 }
 0x321   :  { %v1625_v57 = vadd.f32 %v2671_v22, %v1624_v40 }
 0x322   :  { %v1506_v2 = vld [vmem:[%s2802_s0 + $0x40] sm:$0xff] }
 0x323   :  { %v1642_v48 = vadd.f32 %v1615_v25, %v1506_v2 }
 0x325   :  { %v1658_v11 = vmax.f32 %v1642_v48, 0.0 }
 0x327   :  { %1674 = vst.msk [vmem:[%s2809_s8 + $0x40] sm:$0xff] %vm74_vm0, %v1658_v11 }
 0x328   :  { %v1626_v32 = vpop.f32.mrf.mxu3 }
 0x329   :  { %v1627_v14 = vadd.f32 %v2671_v22, %v1626_v32 }
 0x32e   :  { %v1507_v38 = vld [vmem:[%s2802_s0 + $0x48] sm:$0xff] }
 0x32f   :  { %v1643_v5 = vadd.f32 %v1617_v39, %v1507_v38 }
 0x330   :  { %v1629_v50 = vpop.f32.mrf.mxu3 }
 0x331   :  { %v1659_v1 = vmax.f32 %v1643_v5, 0.0  ;;  %v1630_v37 = vadd.f32 %v2671_v22, %v1629_v50 }
 0x333   :  { %1675 = vst.msk [vmem:[%s2809_s8 + $0x48] sm:$0xff] %vm74_vm0, %v1659_v1 }
 0x338   :  { %v1631_v17 = vpop.f32.mrf.mxu3 }
 0x339   :  { %v1632_v41 = vadd.f32 %v2671_v22, %v1631_v17 }
 0x33a   :  { %v1508_v61 = vld [vmem:[%s2802_s0 + $0x50] sm:$0xff] }
 0x33b   :  { %v1644_v36 = vadd.f32 %v1620_v34, %v1508_v61 }
 0x33d   :  { %v1660_v47 = vmax.f32 %v1644_v36, 0.0 }
 0x33f   :  { %1676 = vst.msk [vmem:[%s2809_s8 + $0x50] sm:$0xff] %vm74_vm0, %v1660_v47 }
 0x346   :  { %v1509_v7 = vld [vmem:[%s2802_s0 + $0x58] sm:$0xff] }
 0x347   :  { %v1645_v55 = vadd.f32 %v1622_v13, %v1509_v7 }
 0x349   :  { %v1661_v30 = vmax.f32 %v1645_v55, 0.0 }
 0x34b   :  { %1677 = vst.msk [vmem:[%s2809_s8 + $0x58] sm:$0xff] %vm74_vm0, %v1661_v30 }
 0x352   :  { %v1510_v29 = vld [vmem:[%s2802_s0 + $0x60] sm:$0xff] }
 0x353   :  { %v1646_v12 = vadd.f32 %v1625_v57, %v1510_v29 }
 0x355   :  { %v1662_v16 = vmax.f32 %v1646_v12, 0.0 }
 0x357   :  { %1678 = vst.msk [vmem:[%s2809_s8 + $0x60] sm:$0xff] %vm74_vm0, %v1662_v16 }
 0x35e   :  { %v1511_v62 = vld [vmem:[%s2802_s0 + $0x68] sm:$0xff] }
 0x35f   :  { %v1647_v15 = vadd.f32 %v1627_v14, %v1511_v62 }
 0x361   :  { %v1663_v31 = vmax.f32 %v1647_v15, 0.0 }
 0x363   :  { %1679 = vst.msk [vmem:[%s2809_s8 + $0x68] sm:$0xff] %vm74_vm0, %v1663_v31 }
 0x36a   :  { %v1512_v8 = vld [vmem:[%s2802_s0 + $0x70] sm:$0xff] }
 0x36b   :  { %v1648_v0 = vadd.f32 %v1630_v37, %v1512_v8 }
 0x36d   :  { %v1664_v18 = vmax.f32 %v1648_v0, 0.0 }
 0x36f   :  { %1680 = vst.msk [vmem:[%s2809_s8 + $0x70] sm:$0xff] %vm74_vm0, %v1664_v18 }
 0x376   :  { %v1513_v21 = vld [vmem:[%s2802_s0 + $0x78] sm:$0xff] }
 0x377   :  { %v1649_v3 = vadd.f32 %v1632_v41, %v1513_v21 }
 0x379   :  { %v1665_v4 = vmax.f32 %v1649_v3, 0.0 }
 0x37b   :  { %1681 = vst.msk [vmem:[%s2809_s8 + $0x78] sm:$0xff] %vm74_vm0, %v1665_v4 }

</bundles_post_ra>
